<compile_context>
chip_gen: v6e
topology: v6e:2x2x1
jax: 0.10.0
libtpu: 0.0.40
codegen_flags: <defaults>
</compile_context>

<pallas_src>
import jax
import jax.numpy as jnp
import numpy as np
from jax import lax
from jax.experimental import pallas as pl
from jax.experimental.pallas import tpu as pltpu


# ----------------------------------------------------------------------------
# Pallas kernel: one (batch-block, time-chunk) grid step of the fused BiLSTM
# ----------------------------------------------------------------------------
def bilstm_kernel(gxf_ref,    # [CHUNK, BB, 4H]  x @ W_ih_f + b_f   (forward time order)
                  gxb_ref,    # [CHUNK, BB, 4H]  x @ W_ih_b + b_b   (reversed chunk order)
                  mf_ref,     # [CHUNK, BB, 1]   f32 mask: t < len  (forward time order)
                  mb_ref,     # [CHUNK, BB, 1]   f32 mask           (reversed chunk order)
                  wbd_ref,    # [2H, 8H] block_diag(W_hh_f, W_hh_b) (g-gate cols pre-scaled x2)
                  wfcf_ref,   # [H, Cp]  fc rows for forward half   (lane padded)
                  wfcb_ref,   # [H, Cp]  fc rows for backward half
                  bfc_ref,    # [1, Cp]
                  out_ref,    # [BB, Cp]
                  state_ref): # [6, BB, H] VMEM scratch: h_f,c_f,s_f,h_b,c_b,s_b
    chunk, _, g4 = gxf_ref.shape
    H = g4 // 4

    c = pl.program_id(1)
    nc = pl.num_programs(1)

    @pl.when(c == 0)
    def _init():
        state_ref[...] = jnp.zeros_like(state_ref)

    # Loop-invariant recurrent weight: load once per chunk.
    wbd = wbd_ref[...]                                     # [2H, 8H]

    def step(s, carry):
        h_f, c_f, a_f, h_b, c_b, a_b = carry
        sb = chunk - 1 - s                                 # backward inner index

        gx_f = gxf_ref[s]                                  # [BB, 4H]
        gx_b = gxb_ref[sb]
        vf = mf_ref[s]                                     # [BB, 1] f32
        vb = mb_ref[sb]

        # Single 256-lane recurrent matmul for both directions.
        h_cat = jnp.concatenate([h_f, h_b], axis=1)        # [BB, 2H]
        g_all = jnp.dot(h_cat, wbd, preferred_element_type=jnp.float32)
        g_f = gx_f + g_all[:, :4 * H]                      # tile-aligned slice
        g_b = gx_b + g_all[:, 4 * H:]

        # One full-width sigmoid per direction; g-gate pre-activation was
        # scaled by 2 in the wrapper so tanh(g) = 2*sigmoid(2g) - 1.
        sig_f = jax.nn.sigmoid(g_f)                        # [BB, 4H]
        sig_b = jax.nn.sigmoid(g_b)

        cf_new = sig_f[:, H:2 * H] * c_f + sig_f[:, :H] * (2.0 * sig_f[:, 2 * H:3 * H] - 1.0)
        cb_new = sig_b[:, H:2 * H] * c_b + sig_b[:, :H] * (2.0 * sig_b[:, 2 * H:3 * H] - 1.0)
        hf_new = sig_f[:, 3 * H:] * jnp.tanh(cf_new)
        hb_new = sig_b[:, 3 * H:] * jnp.tanh(cb_new)

        # Arithmetic blend with the precomputed f32 masks (no bool broadcast).
        h_f = h_f + vf * (hf_new - h_f)
        c_f = c_f + vf * (cf_new - c_f)
        a_f = a_f + vf * hf_new
        h_b = h_b + vb * (hb_new - h_b)
        c_b = c_b + vb * (cb_new - c_b)
        a_b = a_b + vb * hb_new
        return h_f, c_f, a_f, h_b, c_b, a_b

    init = (state_ref[0], state_ref[1], state_ref[2],
            state_ref[3], state_ref[4], state_ref[5])
    # Partial unroll: enough for the scheduler to interleave the two chains.
    h_f, c_f, a_f, h_b, c_b, a_b = lax.fori_loop(
        0, chunk, step, init, unroll=min(8, chunk))

    state_ref[0] = h_f
    state_ref[1] = c_f
    state_ref[2] = a_f
    state_ref[3] = h_b
    state_ref[4] = c_b
    state_ref[5] = a_b

    # Lane-dense FC (no concat) on the last time chunk only.
    @pl.when(c == nc - 1)
    def _fc():
        out_ref[...] = (jnp.dot(a_f, wfcf_ref[...], preferred_element_type=jnp.float32)
                        + jnp.dot(a_b, wfcb_ref[...], preferred_element_type=jnp.float32)
                        + bfc_ref[...])


# ----------------------------------------------------------------------------
# Wrapper: pre-project embedding table, build masks / fused weights, pallas_call
# ----------------------------------------------------------------------------
def bilstm_forward(sequences, sequence_length, params, *, chunk=128):
    """sequences: [B, T] int32, sequence_length: [B] int32 -> [B, C] f32."""
    B, T = sequences.shape
    H = params["whh_f"].shape[0]
    C = params["wfc"].shape[1]

    BB = 8                                        # batch block (sublane multiple)
    B_pad = ((B + BB - 1) // BB) * BB
    NB = B_pad // BB
    CHUNK = min(chunk, T)                         # time-chunk to stream per grid step
    T_pad = ((T + CHUNK - 1) // CHUNK) * CHUNK
    NC = T_pad // CHUNK
    C_pad = max(128, ((C + 127) // 128) * 128)    # lane-dense output store

    f32 = jnp.float32

    # Scale the g-gate columns by 2 so the kernel uses one full-width sigmoid
    # per direction (tanh(x) = 2*sigmoid(2x) - 1).
    def scale_g(w):
        return jnp.concatenate(
            [w[..., :2 * H], 2.0 * w[..., 2 * H:3 * H], w[..., 3 * H:]], axis=-1)

    wih_f = scale_g(params["wih_f"].astype(f32))
    wih_b = scale_g(params["wih_b"].astype(f32))
    b_f = scale_g(params["b_f"].astype(f32))
    b_b = scale_g(params["b_b"].astype(f32))
    whh_f = scale_g(params["whh_f"].astype(f32))
    whh_b = scale_g(params["whh_b"].astype(f32))

    # Block-diagonal recurrent weight -> ONE 256-lane matmul per fused step.
    zhh = jnp.zeros((H, 4 * H), f32)
    w_bd = jnp.concatenate(
        [jnp.concatenate([whh_f, zhh], axis=1),
         jnp.concatenate([zhh, whh_b], axis=1)], axis=0)            # [2H, 8H]

    # Pre-project the embedding table through the input weights (+ biases).
    # NOTE: only cheaper than projecting activations while VOCAB < T*B rows.
    w_in = jnp.concatenate([wih_f, wih_b], axis=1)                  # [D, 8H]
    b_in = jnp.concatenate([b_f, b_b], axis=1)                      # [1, 8H]
    table = params["embedding"].astype(f32) @ w_in + b_in           # [V, 8H]

    gx = jnp.take(table, sequences, axis=0)                         # [B, T, 8H]
    gx = jnp.transpose(gx, (1, 0, 2))                               # [T, B, 8H]
    gx = jnp.pad(gx, ((0, T_pad - T), (0, B_pad - B), (0, 0)))
    gx_f = gx[:, :, :4 * H]                                         # [Tp, Bp, 4H]
    gx_b = gx[:, :, 4 * H:]

    # Precomputed validity masks; padded rows get length 0, padded time steps
    # are automatically invalid for every row.
    lens = jnp.pad(sequence_length.astype(jnp.int32), (0, B_pad - B))
    t_idx = jnp.arange(T_pad, dtype=jnp.int32)[:, None]
    mask = (t_idx < lens[None, :]).astype(f32)[:, :, None]          # [Tp, Bp, 1]

    wfc_f = jnp.pad(params["wfc"][:H].astype(f32), ((0, 0), (0, C_pad - C)))
    wfc_b = jnp.pad(params["wfc"][H:].astype(f32), ((0, 0), (0, C_pad - C)))
    bfc = jnp.pad(params["bfc"].astype(f32), ((0, 0), (0, C_pad - C)))

    fwd_map = lambda b, c: (c, b, 0)
    bwd_map = lambda b, c: (NC - 1 - c, b, 0)
    const2d = lambda b, c: (0, 0)

    out = pl.pallas_call(
        bilstm_kernel,
        out_shape=jax.ShapeDtypeStruct((B_pad, C_pad), f32),
        grid_spec=pltpu.PrefetchScalarGridSpec(
            num_scalar_prefetch=0,
            grid=(NB, NC),                     # (batch blocks, time chunks)
            in_specs=[
                pl.BlockSpec((CHUNK, BB, 4 * H), fwd_map),   # gx_f
                pl.BlockSpec((CHUNK, BB, 4 * H), bwd_map),   # gx_b (reversed chunks)
                pl.BlockSpec((CHUNK, BB, 1), fwd_map),       # mask (forward order)
                pl.BlockSpec((CHUNK, BB, 1), bwd_map),       # mask (reversed order)
                pl.BlockSpec((2 * H, 8 * H), const2d),       # block-diag W_hh
                pl.BlockSpec((H, C_pad), const2d),           # fc forward half
                pl.BlockSpec((H, C_pad), const2d),           # fc backward half
                pl.BlockSpec((1, C_pad), const2d),           # fc bias
            ],
            out_specs=pl.BlockSpec((BB, C_pad), lambda b, c: (b, 0)),
            scratch_shapes=[pltpu.VMEM((6, BB, H), f32)],    # persistent h/c/sum state
        ),
        compiler_params=pltpu.CompilerParams(
            dimension_semantics=("parallel", "arbitrary"),
            vmem_limit_bytes=48 * 1024 * 1024,               # explicit, leaves headroom on v7x
        ),
    )(gx_f, gx_b, mask, mask, w_bd, wfc_f, wfc_b, bfc)
    return out[:B, :C]


# ----------------------------------------------------------------------------
# Pure-numpy reference (same packed-sequence semantics) for validation
# ----------------------------------------------------------------------------
def ref_forward(sequences, sequence_length, p):
    emb = np.asarray(p["embedding"])[np.asarray(sequences)]
    B, T, _ = emb.shape
    H = p["whh_f"].shape[0]
    lens = np.asarray(sequence_length).reshape(B, 1)

    def sigmoid(z):
        return 1.0 / (1.0 + np.exp(-z))

    def run(wih, whh, b, order):
        h = np.zeros((B, H), np.float32)
        c = np.zeros((B, H), np.float32)
        s = np.zeros((B, H), np.float32)
        for t in order:
            g = emb[:, t, :] @ np.asarray(wih) + h @ np.asarray(whh) + np.asarray(b)
            i = sigmoid(g[:, :H]); f = sigmoid(g[:, H:2 * H])
            gg = np.tanh(g[:, 2 * H:3 * H]); o = sigmoid(g[:, 3 * H:])
            c_new = f * c + i * gg
            h_new = o * np.tanh(c_new)
            valid = t < lens
            h = np.where(valid, h_new, h)
            c = np.where(valid, c_new, c)
            s = s + np.where(valid, h_new, 0.0)
        return s

    sum_f = run(p["wih_f"], p["whh_f"], p["b_f"], range(T))
    sum_b = run(p["wih_b"], p["whh_b"], p["b_b"], range(T - 1, -1, -1))
    summed = np.concatenate([sum_f, sum_b], axis=-1)
    return summed @ np.asarray(p["wfc"]) + np.asarray(p["bfc"])


# ----------------------------------------------------------------------------
if __name__ == "__main__":
    # small config: word_dims=32, hidden_size=32, num_classes=8
    VOCAB, D, H, C = 16, 32, 32, 8
    B, T = 4, 8

    key = jax.random.PRNGKey(0)
    ks = jax.random.split(key, 12)

    params = {
        "embedding": 0.1 * jax.random.normal(ks[0], (VOCAB, D), jnp.float32),
        "wih_f": 0.1 * jax.random.normal(ks[1], (D, 4 * H), jnp.float32),
        "whh_f": 0.1 * jax.random.normal(ks[2], (H, 4 * H), jnp.float32),
        "b_f":   0.1 * jax.random.normal(ks[3], (1, 4 * H), jnp.float32),
        "wih_b": 0.1 * jax.random.normal(ks[4], (D, 4 * H), jnp.float32),
        "whh_b": 0.1 * jax.random.normal(ks[5], (H, 4 * H), jnp.float32),
        "b_b":   0.1 * jax.random.normal(ks[6], (1, 4 * H), jnp.float32),
        "wfc":   0.1 * jax.random.normal(ks[7], (2 * H, C), jnp.float32),
        "bfc":   0.1 * jax.random.normal(ks[8], (1, C), jnp.float32),
    }

    # deterministic token ids, sorted-descending lengths, padding idx 0 past length
    sequence_length = jnp.array([8, 6, 5, 3], dtype=jnp.int32)
    tok = jax.random.randint(ks[9], (B, T), 1, VOCAB, dtype=jnp.int32)
    time_idx = jnp.arange(T)[None, :]
    sequences = jnp.where(time_idx < sequence_length[:, None], tok, 0)

    out = bilstm_forward(sequences, sequence_length, params)
    out = jax.block_until_ready(out)

    ref = ref_forward(sequences, sequence_length, params)
    np.testing.assert_allclose(np.asarray(out), ref, rtol=1e-4, atol=1e-4)
    print("KERNEL_OK")
</pallas_src>

<mosaic_0001>
module attributes {stable_mosaic.version = 11 : i64} {
  func.func @bilstm_kernel(%arg0: i32, %arg1: i32, %arg2: memref<8x8x128xf32, #tpu.memory_space<vmem>>, %arg3: memref<8x8x128xf32, #tpu.memory_space<vmem>>, %arg4: memref<8x8x1xf32, #tpu.memory_space<vmem>>, %arg5: memref<8x8x1xf32, #tpu.memory_space<vmem>>, %arg6: memref<64x256xf32, #tpu.memory_space<vmem>>, %arg7: memref<32x128xf32, #tpu.memory_space<vmem>>, %arg8: memref<32x128xf32, #tpu.memory_space<vmem>>, %arg9: memref<1x128xf32, #tpu.memory_space<vmem>>, %arg10: memref<8x128xf32, #tpu.memory_space<vmem>>, %arg11: memref<6x8x32xf32, #tpu.memory_space<vmem>>) attributes {dimension_semantics = [#tpu.dimension_semantics<parallel>, #tpu.dimension_semantics<arbitrary>], iteration_bounds = array<i64: 1, 1>, scalar_prefetch = 0 : i64, scratch_operands = 1 : i64, tpu.core_type = #tpu.core_type<tc>, window_params = [{transform_indices = @transform_0, window_bounds = array<i64: 8, 8, 128>}, {transform_indices = @transform_1, window_bounds = array<i64: 8, 8, 128>}, {transform_indices = @transform_2, window_bounds = array<i64: 8, 8, 1>}, {transform_indices = @transform_3, window_bounds = array<i64: 8, 8, 1>}, {pipeline_mode = #tpu.pipeline_mode<synchronous>, transform_indices = @transform_4, window_bounds = array<i64: 64, 256>}, {pipeline_mode = #tpu.pipeline_mode<synchronous>, transform_indices = @transform_5, window_bounds = array<i64: 32, 128>}, {pipeline_mode = #tpu.pipeline_mode<synchronous>, transform_indices = @transform_6, window_bounds = array<i64: 32, 128>}, {pipeline_mode = #tpu.pipeline_mode<synchronous>, transform_indices = @transform_7, window_bounds = array<i64: 1, 128>}, {transform_indices = @transform_8, window_bounds = array<i64: 8, 128>}]} {
    %c0_i32 = arith.constant 0 : i32
    %0 = arith.cmpi eq, %arg1, %c0_i32 : i32
    %1 = arith.extui %0 : i1 to i32
    %c0_i32_0 = arith.constant 0 : i32
    %2 = arith.cmpi ne, %1, %c0_i32_0 : i32
    scf.if %2 {
      %cst_163 = arith.constant 0.000000e+00 : f32
      %653 = vector.broadcast %cst_163 : f32 to vector<6x8x32xf32>
      %c0_164 = arith.constant 0 : index
      %c0_165 = arith.constant 0 : index
      %c0_166 = arith.constant 0 : index
      %654 = vector.load %arg11[%c0_164, %c0_165, %c0_166] : memref<6x8x32xf32, #tpu.memory_space<vmem>>, vector<6x8x32xf32>
      tpu.vector_store %arg11[%c0_164, %c0_165, %c0_166], %653 {strides = array<i32>} : memref<6x8x32xf32, #tpu.memory_space<vmem>>, vector<6x8x32xf32>,
    } else {
    }
    %c0 = arith.constant 0 : index
    %c0_1 = arith.constant 0 : index
    %3 = vector.load %arg6[%c0, %c0_1] : memref<64x256xf32, #tpu.memory_space<vmem>>, vector<64x256xf32>
    %c0_2 = arith.constant 0 : index
    %c0_3 = arith.constant 0 : index
    %c0_4 = arith.constant 0 : index
    %4 = vector.load %arg11[%c0_2, %c0_3, %c0_4] : memref<6x8x32xf32, #tpu.memory_space<vmem>>, vector<1x8x32xf32>
    %5 = vector.shape_cast %4 : vector<1x8x32xf32> to vector<8x32xf32>
    %c1 = arith.constant 1 : index
    %c0_5 = arith.constant 0 : index
    %c0_6 = arith.constant 0 : index
    %6 = vector.load %arg11[%c1, %c0_5, %c0_6] : memref<6x8x32xf32, #tpu.memory_space<vmem>>, vector<1x8x32xf32>
    %7 = vector.shape_cast %6 : vector<1x8x32xf32> to vector<8x32xf32>
    %c2 = arith.constant 2 : index
    %c0_7 = arith.constant 0 : index
    %c0_8 = arith.constant 0 : index
    %8 = vector.load %arg11[%c2, %c0_7, %c0_8] : memref<6x8x32xf32, #tpu.memory_space<vmem>>, vector<1x8x32xf32>
    %9 = vector.shape_cast %8 : vector<1x8x32xf32> to vector<8x32xf32>
    %c3 = arith.constant 3 : index
    %c0_9 = arith.constant 0 : index
    %c0_10 = arith.constant 0 : index
    %10 = vector.load %arg11[%c3, %c0_9, %c0_10] : memref<6x8x32xf32, #tpu.memory_space<vmem>>, vector<1x8x32xf32>
    %11 = vector.shape_cast %10 : vector<1x8x32xf32> to vector<8x32xf32>
    %c4 = arith.constant 4 : index
    %c0_11 = arith.constant 0 : index
    %c0_12 = arith.constant 0 : index
    %12 = vector.load %arg11[%c4, %c0_11, %c0_12] : memref<6x8x32xf32, #tpu.memory_space<vmem>>, vector<1x8x32xf32>
    %13 = vector.shape_cast %12 : vector<1x8x32xf32> to vector<8x32xf32>
    %c5 = arith.constant 5 : index
    %c0_13 = arith.constant 0 : index
    %c0_14 = arith.constant 0 : index
    %14 = vector.load %arg11[%c5, %c0_13, %c0_14] : memref<6x8x32xf32, #tpu.memory_space<vmem>>, vector<1x8x32xf32>
    %15 = vector.shape_cast %14 : vector<1x8x32xf32> to vector<8x32xf32>
    %c0_i32_15 = arith.constant 0 : i32
    %c7_i32 = arith.constant 7 : i32
    %16 = arith.subi %c7_i32, %c0_i32_15 : i32
    %17 = arith.index_cast %c0_i32_15 : i32 to index
    %c0_16 = arith.constant 0 : index
    %c0_17 = arith.constant 0 : index
    %18 = vector.load %arg2[%17, %c0_16, %c0_17] : memref<8x8x128xf32, #tpu.memory_space<vmem>>, vector<1x8x128xf32>
    %19 = vector.shape_cast %18 : vector<1x8x128xf32> to vector<8x128xf32>
    %20 = arith.index_cast %16 : i32 to index
    %c0_18 = arith.constant 0 : index
    %c0_19 = arith.constant 0 : index
    %21 = vector.load %arg3[%20, %c0_18, %c0_19] : memref<8x8x128xf32, #tpu.memory_space<vmem>>, vector<1x8x128xf32>
    %22 = vector.shape_cast %21 : vector<1x8x128xf32> to vector<8x128xf32>
    %23 = arith.index_cast %c0_i32_15 : i32 to index
    %c0_20 = arith.constant 0 : index
    %c0_21 = arith.constant 0 : index
    %24 = vector.load %arg4[%23, %c0_20, %c0_21] : memref<8x8x1xf32, #tpu.memory_space<vmem>>, vector<1x8x1xf32>
    %25 = vector.shape_cast %24 : vector<1x8x1xf32> to vector<8x1xf32>
    %26 = arith.index_cast %16 : i32 to index
    %c0_22 = arith.constant 0 : index
    %c0_23 = arith.constant 0 : index
    %27 = vector.load %arg5[%26, %c0_22, %c0_23] : memref<8x8x1xf32, #tpu.memory_space<vmem>>, vector<1x8x1xf32>
    %28 = vector.shape_cast %27 : vector<1x8x1xf32> to vector<8x1xf32>
    %29 = tpu.concatenate %5, %11 in 1 : vector<8x32xf32>, vector<8x32xf32> -> vector<8x64xf32>
    %cst = arith.constant dense<0.000000e+00> : vector<8x256xf32>
    %30 = tpu.matmul %29, %3, %cst {dimension_numbers = #tpu.dot_dimension_numbers<[1], [0], [0], [1], [0, 0, 1, 1], [], []>} : vector<8x64xf32>, vector<64x256xf32>, vector<8x256xf32> -> vector<8x256xf32>
    %31 = vector.extract_strided_slice %30 {offsets = [0, 0], sizes = [8, 128], strides = [1, 1]} : vector<8x256xf32> to vector<8x128xf32>
    %32 = arith.addf %19, %31 : vector<8x128xf32>
    %33 = vector.extract_strided_slice %30 {offsets = [0, 128], sizes = [8, 128], strides = [1, 1]} : vector<8x256xf32> to vector<8x128xf32>
    %34 = arith.addf %22, %33 : vector<8x128xf32>
    %35 = arith.negf %32 : vector<8x128xf32>
    %36 = math.exp %35 : vector<8x128xf32>
    %cst_24 = arith.constant 1.000000e+00 : f32
    %37 = vector.broadcast %cst_24 : f32 to vector<8x128xf32>
    %38 = arith.addf %37, %36 : vector<8x128xf32>
    %39 = arith.divf %37, %38 : vector<8x128xf32>
    %40 = arith.negf %34 : vector<8x128xf32>
    %41 = math.exp %40 : vector<8x128xf32>
    %cst_25 = arith.constant 1.000000e+00 : f32
    %42 = vector.broadcast %cst_25 : f32 to vector<8x128xf32>
    %43 = arith.addf %42, %41 : vector<8x128xf32>
    %44 = arith.divf %42, %43 : vector<8x128xf32>
    %45 = vector.extract_strided_slice %39 {offsets = [0, 32], sizes = [8, 32], strides = [1, 1]} : vector<8x128xf32> to vector<8x32xf32>
    %46 = arith.mulf %45, %7 : vector<8x32xf32>
    %47 = vector.extract_strided_slice %39 {offsets = [0, 0], sizes = [8, 32], strides = [1, 1]} : vector<8x128xf32> to vector<8x32xf32>
    %48 = vector.extract_strided_slice %39 {offsets = [0, 64], sizes = [8, 32], strides = [1, 1]} : vector<8x128xf32> to vector<8x32xf32>
    %cst_26 = arith.constant 2.000000e+00 : f32
    %49 = vector.broadcast %cst_26 : f32 to vector<8x32xf32>
    %50 = arith.mulf %49, %48 : vector<8x32xf32>
    %cst_27 = arith.constant 1.000000e+00 : f32
    %51 = vector.broadcast %cst_27 : f32 to vector<8x32xf32>
    %52 = arith.subf %50, %51 : vector<8x32xf32>
    %53 = arith.mulf %47, %52 : vector<8x32xf32>
    %54 = arith.addf %46, %53 : vector<8x32xf32>
    %55 = vector.extract_strided_slice %44 {offsets = [0, 32], sizes = [8, 32], strides = [1, 1]} : vector<8x128xf32> to vector<8x32xf32>
    %56 = arith.mulf %55, %13 : vector<8x32xf32>
    %57 = vector.extract_strided_slice %44 {offsets = [0, 0], sizes = [8, 32], strides = [1, 1]} : vector<8x128xf32> to vector<8x32xf32>
    %58 = vector.extract_strided_slice %44 {offsets = [0, 64], sizes = [8, 32], strides = [1, 1]} : vector<8x128xf32> to vector<8x32xf32>
    %cst_28 = arith.constant 2.000000e+00 : f32
    %59 = vector.broadcast %cst_28 : f32 to vector<8x32xf32>
    %60 = arith.mulf %59, %58 : vector<8x32xf32>
    %cst_29 = arith.constant 1.000000e+00 : f32
    %61 = vector.broadcast %cst_29 : f32 to vector<8x32xf32>
    %62 = arith.subf %60, %61 : vector<8x32xf32>
    %63 = arith.mulf %57, %62 : vector<8x32xf32>
    %64 = arith.addf %56, %63 : vector<8x32xf32>
    %65 = vector.extract_strided_slice %39 {offsets = [0, 96], sizes = [8, 32], strides = [1, 1]} : vector<8x128xf32> to vector<8x32xf32>
    %66 = math.tanh %54 : vector<8x32xf32>
    %67 = arith.mulf %65, %66 : vector<8x32xf32>
    %68 = vector.extract_strided_slice %44 {offsets = [0, 96], sizes = [8, 32], strides = [1, 1]} : vector<8x128xf32> to vector<8x32xf32>
    %69 = math.tanh %64 : vector<8x32xf32>
    %70 = arith.mulf %68, %69 : vector<8x32xf32>
    %71 = arith.subf %67, %5 : vector<8x32xf32>
    %72 = vector.broadcast %25 : vector<8x1xf32> to vector<8x32xf32>
    %73 = arith.mulf %72, %71 : vector<8x32xf32>
    %74 = arith.addf %5, %73 : vector<8x32xf32>
    %75 = arith.subf %54, %7 : vector<8x32xf32>
    %76 = vector.broadcast %25 : vector<8x1xf32> to vector<8x32xf32>
    %77 = arith.mulf %76, %75 : vector<8x32xf32>
    %78 = arith.addf %7, %77 : vector<8x32xf32>
    %79 = vector.broadcast %25 : vector<8x1xf32> to vector<8x32xf32>
    %80 = arith.mulf %79, %67 : vector<8x32xf32>
    %81 = arith.addf %9, %80 : vector<8x32xf32>
    %82 = arith.subf %70, %11 : vector<8x32xf32>
    %83 = vector.broadcast %28 : vector<8x1xf32> to vector<8x32xf32>
    %84 = arith.mulf %83, %82 : vector<8x32xf32>
    %85 = arith.addf %11, %84 : vector<8x32xf32>
    %86 = arith.subf %64, %13 : vector<8x32xf32>
    %87 = vector.broadcast %28 : vector<8x1xf32> to vector<8x32xf32>
    %88 = arith.mulf %87, %86 : vector<8x32xf32>
    %89 = arith.addf %13, %88 : vector<8x32xf32>
    %90 = vector.broadcast %28 : vector<8x1xf32> to vector<8x32xf32>
    %91 = arith.mulf %90, %70 : vector<8x32xf32>
    %92 = arith.addf %15, %91 : vector<8x32xf32>
    %c1_i32 = arith.constant 1 : i32
    %c7_i32_30 = arith.constant 7 : i32
    %93 = arith.subi %c7_i32_30, %c1_i32 : i32
    %94 = arith.index_cast %c1_i32 : i32 to index
    %c0_31 = arith.constant 0 : index
    %c0_32 = arith.constant 0 : index
    %95 = vector.load %arg2[%94, %c0_31, %c0_32] : memref<8x8x128xf32, #tpu.memory_space<vmem>>, vector<1x8x128xf32>
    %96 = vector.shape_cast %95 : vector<1x8x128xf32> to vector<8x128xf32>
    %97 = arith.index_cast %93 : i32 to index
    %c0_33 = arith.constant 0 : index
    %c0_34 = arith.constant 0 : index
    %98 = vector.load %arg3[%97, %c0_33, %c0_34] : memref<8x8x128xf32, #tpu.memory_space<vmem>>, vector<1x8x128xf32>
    %99 = vector.shape_cast %98 : vector<1x8x128xf32> to vector<8x128xf32>
    %100 = arith.index_cast %c1_i32 : i32 to index
    %c0_35 = arith.constant 0 : index
    %c0_36 = arith.constant 0 : index
    %101 = vector.load %arg4[%100, %c0_35, %c0_36] : memref<8x8x1xf32, #tpu.memory_space<vmem>>, vector<1x8x1xf32>
    %102 = vector.shape_cast %101 : vector<1x8x1xf32> to vector<8x1xf32>
    %103 = arith.index_cast %93 : i32 to index
    %c0_37 = arith.constant 0 : index
    %c0_38 = arith.constant 0 : index
    %104 = vector.load %arg5[%103, %c0_37, %c0_38] : memref<8x8x1xf32, #tpu.memory_space<vmem>>, vector<1x8x1xf32>
    %105 = vector.shape_cast %104 : vector<1x8x1xf32> to vector<8x1xf32>
    %106 = tpu.concatenate %74, %85 in 1 : vector<8x32xf32>, vector<8x32xf32> -> vector<8x64xf32>
    %cst_39 = arith.constant dense<0.000000e+00> : vector<8x256xf32>
    %107 = tpu.matmul %106, %3, %cst_39 {dimension_numbers = #tpu.dot_dimension_numbers<[1], [0], [0], [1], [0, 0, 1, 1], [], []>} : vector<8x64xf32>, vector<64x256xf32>, vector<8x256xf32> -> vector<8x256xf32>
    %108 = vector.extract_strided_slice %107 {offsets = [0, 0], sizes = [8, 128], strides = [1, 1]} : vector<8x256xf32> to vector<8x128xf32>
    %109 = arith.addf %96, %108 : vector<8x128xf32>
    %110 = vector.extract_strided_slice %107 {offsets = [0, 128], sizes = [8, 128], strides = [1, 1]} : vector<8x256xf32> to vector<8x128xf32>
    %111 = arith.addf %99, %110 : vector<8x128xf32>
    %112 = arith.negf %109 : vector<8x128xf32>
    %113 = math.exp %112 : vector<8x128xf32>
    %cst_40 = arith.constant 1.000000e+00 : f32
    %114 = vector.broadcast %cst_40 : f32 to vector<8x128xf32>
    %115 = arith.addf %114, %113 : vector<8x128xf32>
    %116 = arith.divf %114, %115 : vector<8x128xf32>
    %117 = arith.negf %111 : vector<8x128xf32>
    %118 = math.exp %117 : vector<8x128xf32>
    %cst_41 = arith.constant 1.000000e+00 : f32
    %119 = vector.broadcast %cst_41 : f32 to vector<8x128xf32>
    %120 = arith.addf %119, %118 : vector<8x128xf32>
    %121 = arith.divf %119, %120 : vector<8x128xf32>
    %122 = vector.extract_strided_slice %116 {offsets = [0, 32], sizes = [8, 32], strides = [1, 1]} : vector<8x128xf32> to vector<8x32xf32>
    %123 = arith.mulf %122, %78 : vector<8x32xf32>
    %124 = vector.extract_strided_slice %116 {offsets = [0, 0], sizes = [8, 32], strides = [1, 1]} : vector<8x128xf32> to vector<8x32xf32>
    %125 = vector.extract_strided_slice %116 {offsets = [0, 64], sizes = [8, 32], strides = [1, 1]} : vector<8x128xf32> to vector<8x32xf32>
    %cst_42 = arith.constant 2.000000e+00 : f32
    %126 = vector.broadcast %cst_42 : f32 to vector<8x32xf32>
    %127 = arith.mulf %126, %125 : vector<8x32xf32>
    %cst_43 = arith.constant 1.000000e+00 : f32
    %128 = vector.broadcast %cst_43 : f32 to vector<8x32xf32>
    %129 = arith.subf %127, %128 : vector<8x32xf32>
    %130 = arith.mulf %124, %129 : vector<8x32xf32>
    %131 = arith.addf %123, %130 : vector<8x32xf32>
    %132 = vector.extract_strided_slice %121 {offsets = [0, 32], sizes = [8, 32], strides = [1, 1]} : vector<8x128xf32> to vector<8x32xf32>
    %133 = arith.mulf %132, %89 : vector<8x32xf32>
    %134 = vector.extract_strided_slice %121 {offsets = [0, 0], sizes = [8, 32], strides = [1, 1]} : vector<8x128xf32> to vector<8x32xf32>
    %135 = vector.extract_strided_slice %121 {offsets = [0, 64], sizes = [8, 32], strides = [1, 1]} : vector<8x128xf32> to vector<8x32xf32>
    %cst_44 = arith.constant 2.000000e+00 : f32
    %136 = vector.broadcast %cst_44 : f32 to vector<8x32xf32>
    %137 = arith.mulf %136, %135 : vector<8x32xf32>
    %cst_45 = arith.constant 1.000000e+00 : f32
    %138 = vector.broadcast %cst_45 : f32 to vector<8x32xf32>
    %139 = arith.subf %137, %138 : vector<8x32xf32>
    %140 = arith.mulf %134, %139 : vector<8x32xf32>
    %141 = arith.addf %133, %140 : vector<8x32xf32>
    %142 = vector.extract_strided_slice %116 {offsets = [0, 96], sizes = [8, 32], strides = [1, 1]} : vector<8x128xf32> to vector<8x32xf32>
    %143 = math.tanh %131 : vector<8x32xf32>
    %144 = arith.mulf %142, %143 : vector<8x32xf32>
    %145 = vector.extract_strided_slice %121 {offsets = [0, 96], sizes = [8, 32], strides = [1, 1]} : vector<8x128xf32> to vector<8x32xf32>
    %146 = math.tanh %141 : vector<8x32xf32>
    %147 = arith.mulf %145, %146 : vector<8x32xf32>
    %148 = arith.subf %144, %74 : vector<8x32xf32>
    %149 = vector.broadcast %102 : vector<8x1xf32> to vector<8x32xf32>
    %150 = arith.mulf %149, %148 : vector<8x32xf32>
    %151 = arith.addf %74, %150 : vector<8x32xf32>
    %152 = arith.subf %131, %78 : vector<8x32xf32>
    %153 = vector.broadcast %102 : vector<8x1xf32> to vector<8x32xf32>
    %154 = arith.mulf %153, %152 : vector<8x32xf32>
    %155 = arith.addf %78, %154 : vector<8x32xf32>
    %156 = vector.broadcast %102 : vector<8x1xf32> to vector<8x32xf32>
    %157 = arith.mulf %156, %144 : vector<8x32xf32>
    %158 = arith.addf %81, %157 : vector<8x32xf32>
    %159 = arith.subf %147, %85 : vector<8x32xf32>
    %160 = vector.broadcast %105 : vector<8x1xf32> to vector<8x32xf32>
    %161 = arith.mulf %160, %159 : vector<8x32xf32>
    %162 = arith.addf %85, %161 : vector<8x32xf32>
    %163 = arith.subf %141, %89 : vector<8x32xf32>
    %164 = vector.broadcast %105 : vector<8x1xf32> to vector<8x32xf32>
    %165 = arith.mulf %164, %163 : vector<8x32xf32>
    %166 = arith.addf %89, %165 : vector<8x32xf32>
    %167 = vector.broadcast %105 : vector<8x1xf32> to vector<8x32xf32>
    %168 = arith.mulf %167, %147 : vector<8x32xf32>
    %169 = arith.addf %92, %168 : vector<8x32xf32>
    %c2_i32 = arith.constant 2 : i32
    %c7_i32_46 = arith.constant 7 : i32
    %170 = arith.subi %c7_i32_46, %c2_i32 : i32
    %171 = arith.index_cast %c2_i32 : i32 to index
    %c0_47 = arith.constant 0 : index
    %c0_48 = arith.constant 0 : index
    %172 = vector.load %arg2[%171, %c0_47, %c0_48] : memref<8x8x128xf32, #tpu.memory_space<vmem>>, vector<1x8x128xf32>
    %173 = vector.shape_cast %172 : vector<1x8x128xf32> to vector<8x128xf32>
    %174 = arith.index_cast %170 : i32 to index
    %c0_49 = arith.constant 0 : index
    %c0_50 = arith.constant 0 : index
    %175 = vector.load %arg3[%174, %c0_49, %c0_50] : memref<8x8x128xf32, #tpu.memory_space<vmem>>, vector<1x8x128xf32>
    %176 = vector.shape_cast %175 : vector<1x8x128xf32> to vector<8x128xf32>
    %177 = arith.index_cast %c2_i32 : i32 to index
    %c0_51 = arith.constant 0 : index
    %c0_52 = arith.constant 0 : index
    %178 = vector.load %arg4[%177, %c0_51, %c0_52] : memref<8x8x1xf32, #tpu.memory_space<vmem>>, vector<1x8x1xf32>
    %179 = vector.shape_cast %178 : vector<1x8x1xf32> to vector<8x1xf32>
    %180 = arith.index_cast %170 : i32 to index
    %c0_53 = arith.constant 0 : index
    %c0_54 = arith.constant 0 : index
    %181 = vector.load %arg5[%180, %c0_53, %c0_54] : memref<8x8x1xf32, #tpu.memory_space<vmem>>, vector<1x8x1xf32>
    %182 = vector.shape_cast %181 : vector<1x8x1xf32> to vector<8x1xf32>
    %183 = tpu.concatenate %151, %162 in 1 : vector<8x32xf32>, vector<8x32xf32> -> vector<8x64xf32>
    %cst_55 = arith.constant dense<0.000000e+00> : vector<8x256xf32>
    %184 = tpu.matmul %183, %3, %cst_55 {dimension_numbers = #tpu.dot_dimension_numbers<[1], [0], [0], [1], [0, 0, 1, 1], [], []>} : vector<8x64xf32>, vector<64x256xf32>, vector<8x256xf32> -> vector<8x256xf32>
    %185 = vector.extract_strided_slice %184 {offsets = [0, 0], sizes = [8, 128], strides = [1, 1]} : vector<8x256xf32> to vector<8x128xf32>
    %186 = arith.addf %173, %185 : vector<8x128xf32>
    %187 = vector.extract_strided_slice %184 {offsets = [0, 128], sizes = [8, 128], strides = [1, 1]} : vector<8x256xf32> to vector<8x128xf32>
    %188 = arith.addf %176, %187 : vector<8x128xf32>
    %189 = arith.negf %186 : vector<8x128xf32>
    %190 = math.exp %189 : vector<8x128xf32>
    %cst_56 = arith.constant 1.000000e+00 : f32
    %191 = vector.broadcast %cst_56 : f32 to vector<8x128xf32>
    %192 = arith.addf %191, %190 : vector<8x128xf32>
    %193 = arith.divf %191, %192 : vector<8x128xf32>
    %194 = arith.negf %188 : vector<8x128xf32>
    %195 = math.exp %194 : vector<8x128xf32>
    %cst_57 = arith.constant 1.000000e+00 : f32
    %196 = vector.broadcast %cst_57 : f32 to vector<8x128xf32>
    %197 = arith.addf %196, %195 : vector<8x128xf32>
    %198 = arith.divf %196, %197 : vector<8x128xf32>
    %199 = vector.extract_strided_slice %193 {offsets = [0, 32], sizes = [8, 32], strides = [1, 1]} : vector<8x128xf32> to vector<8x32xf32>
    %200 = arith.mulf %199, %155 : vector<8x32xf32>
    %201 = vector.extract_strided_slice %193 {offsets = [0, 0], sizes = [8, 32], strides = [1, 1]} : vector<8x128xf32> to vector<8x32xf32>
    %202 = vector.extract_strided_slice %193 {offsets = [0, 64], sizes = [8, 32], strides = [1, 1]} : vector<8x128xf32> to vector<8x32xf32>
    %cst_58 = arith.constant 2.000000e+00 : f32
    %203 = vector.broadcast %cst_58 : f32 to vector<8x32xf32>
    %204 = arith.mulf %203, %202 : vector<8x32xf32>
    %cst_59 = arith.constant 1.000000e+00 : f32
    %205 = vector.broadcast %cst_59 : f32 to vector<8x32xf32>
    %206 = arith.subf %204, %205 : vector<8x32xf32>
    %207 = arith.mulf %201, %206 : vector<8x32xf32>
    %208 = arith.addf %200, %207 : vector<8x32xf32>
    %209 = vector.extract_strided_slice %198 {offsets = [0, 32], sizes = [8, 32], strides = [1, 1]} : vector<8x128xf32> to vector<8x32xf32>
    %210 = arith.mulf %209, %166 : vector<8x32xf32>
    %211 = vector.extract_strided_slice %198 {offsets = [0, 0], sizes = [8, 32], strides = [1, 1]} : vector<8x128xf32> to vector<8x32xf32>
    %212 = vector.extract_strided_slice %198 {offsets = [0, 64], sizes = [8, 32], strides = [1, 1]} : vector<8x128xf32> to vector<8x32xf32>
    %cst_60 = arith.constant 2.000000e+00 : f32
    %213 = vector.broadcast %cst_60 : f32 to vector<8x32xf32>
    %214 = arith.mulf %213, %212 : vector<8x32xf32>
    %cst_61 = arith.constant 1.000000e+00 : f32
    %215 = vector.broadcast %cst_61 : f32 to vector<8x32xf32>
    %216 = arith.subf %214, %215 : vector<8x32xf32>
    %217 = arith.mulf %211, %216 : vector<8x32xf32>
    %218 = arith.addf %210, %217 : vector<8x32xf32>
    %219 = vector.extract_strided_slice %193 {offsets = [0, 96], sizes = [8, 32], strides = [1, 1]} : vector<8x128xf32> to vector<8x32xf32>
    %220 = math.tanh %208 : vector<8x32xf32>
    %221 = arith.mulf %219, %220 : vector<8x32xf32>
    %222 = vector.extract_strided_slice %198 {offsets = [0, 96], sizes = [8, 32], strides = [1, 1]} : vector<8x128xf32> to vector<8x32xf32>
    %223 = math.tanh %218 : vector<8x32xf32>
    %224 = arith.mulf %222, %223 : vector<8x32xf32>
    %225 = arith.subf %221, %151 : vector<8x32xf32>
    %226 = vector.broadcast %179 : vector<8x1xf32> to vector<8x32xf32>
    %227 = arith.mulf %226, %225 : vector<8x32xf32>
    %228 = arith.addf %151, %227 : vector<8x32xf32>
    %229 = arith.subf %208, %155 : vector<8x32xf32>
    %230 = vector.broadcast %179 : vector<8x1xf32> to vector<8x32xf32>
    %231 = arith.mulf %230, %229 : vector<8x32xf32>
    %232 = arith.addf %155, %231 : vector<8x32xf32>
    %233 = vector.broadcast %179 : vector<8x1xf32> to vector<8x32xf32>
    %234 = arith.mulf %233, %221 : vector<8x32xf32>
    %235 = arith.addf %158, %234 : vector<8x32xf32>
    %236 = arith.subf %224, %162 : vector<8x32xf32>
    %237 = vector.broadcast %182 : vector<8x1xf32> to vector<8x32xf32>
    %238 = arith.mulf %237, %236 : vector<8x32xf32>
    %239 = arith.addf %162, %238 : vector<8x32xf32>
    %240 = arith.subf %218, %166 : vector<8x32xf32>
    %241 = vector.broadcast %182 : vector<8x1xf32> to vector<8x32xf32>
    %242 = arith.mulf %241, %240 : vector<8x32xf32>
    %243 = arith.addf %166, %242 : vector<8x32xf32>
    %244 = vector.broadcast %182 : vector<8x1xf32> to vector<8x32xf32>
    %245 = arith.mulf %244, %224 : vector<8x32xf32>
    %246 = arith.addf %169, %245 : vector<8x32xf32>
    %c3_i32 = arith.constant 3 : i32
    %c7_i32_62 = arith.constant 7 : i32
    %247 = arith.subi %c7_i32_62, %c3_i32 : i32
    %248 = arith.index_cast %c3_i32 : i32 to index
    %c0_63 = arith.constant 0 : index
    %c0_64 = arith.constant 0 : index
    %249 = vector.load %arg2[%248, %c0_63, %c0_64] : memref<8x8x128xf32, #tpu.memory_space<vmem>>, vector<1x8x128xf32>
    %250 = vector.shape_cast %249 : vector<1x8x128xf32> to vector<8x128xf32>
    %251 = arith.index_cast %247 : i32 to index
    %c0_65 = arith.constant 0 : index
    %c0_66 = arith.constant 0 : index
    %252 = vector.load %arg3[%251, %c0_65, %c0_66] : memref<8x8x128xf32, #tpu.memory_space<vmem>>, vector<1x8x128xf32>
    %253 = vector.shape_cast %252 : vector<1x8x128xf32> to vector<8x128xf32>
    %254 = arith.index_cast %c3_i32 : i32 to index
    %c0_67 = arith.constant 0 : index
    %c0_68 = arith.constant 0 : index
    %255 = vector.load %arg4[%254, %c0_67, %c0_68] : memref<8x8x1xf32, #tpu.memory_space<vmem>>, vector<1x8x1xf32>
    %256 = vector.shape_cast %255 : vector<1x8x1xf32> to vector<8x1xf32>
    %257 = arith.index_cast %247 : i32 to index
    %c0_69 = arith.constant 0 : index
    %c0_70 = arith.constant 0 : index
    %258 = vector.load %arg5[%257, %c0_69, %c0_70] : memref<8x8x1xf32, #tpu.memory_space<vmem>>, vector<1x8x1xf32>
    %259 = vector.shape_cast %258 : vector<1x8x1xf32> to vector<8x1xf32>
    %260 = tpu.concatenate %228, %239 in 1 : vector<8x32xf32>, vector<8x32xf32> -> vector<8x64xf32>
    %cst_71 = arith.constant dense<0.000000e+00> : vector<8x256xf32>
    %261 = tpu.matmul %260, %3, %cst_71 {dimension_numbers = #tpu.dot_dimension_numbers<[1], [0], [0], [1], [0, 0, 1, 1], [], []>} : vector<8x64xf32>, vector<64x256xf32>, vector<8x256xf32> -> vector<8x256xf32>
    %262 = vector.extract_strided_slice %261 {offsets = [0, 0], sizes = [8, 128], strides = [1, 1]} : vector<8x256xf32> to vector<8x128xf32>
    %263 = arith.addf %250, %262 : vector<8x128xf32>
    %264 = vector.extract_strided_slice %261 {offsets = [0, 128], sizes = [8, 128], strides = [1, 1]} : vector<8x256xf32> to vector<8x128xf32>
    %265 = arith.addf %253, %264 : vector<8x128xf32>
    %266 = arith.negf %263 : vector<8x128xf32>
    %267 = math.exp %266 : vector<8x128xf32>
    %cst_72 = arith.constant 1.000000e+00 : f32
    %268 = vector.broadcast %cst_72 : f32 to vector<8x128xf32>
    %269 = arith.addf %268, %267 : vector<8x128xf32>
    %270 = arith.divf %268, %269 : vector<8x128xf32>
    %271 = arith.negf %265 : vector<8x128xf32>
    %272 = math.exp %271 : vector<8x128xf32>
    %cst_73 = arith.constant 1.000000e+00 : f32
    %273 = vector.broadcast %cst_73 : f32 to vector<8x128xf32>
    %274 = arith.addf %273, %272 : vector<8x128xf32>
    %275 = arith.divf %273, %274 : vector<8x128xf32>
    %276 = vector.extract_strided_slice %270 {offsets = [0, 32], sizes = [8, 32], strides = [1, 1]} : vector<8x128xf32> to vector<8x32xf32>
    %277 = arith.mulf %276, %232 : vector<8x32xf32>
    %278 = vector.extract_strided_slice %270 {offsets = [0, 0], sizes = [8, 32], strides = [1, 1]} : vector<8x128xf32> to vector<8x32xf32>
    %279 = vector.extract_strided_slice %270 {offsets = [0, 64], sizes = [8, 32], strides = [1, 1]} : vector<8x128xf32> to vector<8x32xf32>
    %cst_74 = arith.constant 2.000000e+00 : f32
    %280 = vector.broadcast %cst_74 : f32 to vector<8x32xf32>
    %281 = arith.mulf %280, %279 : vector<8x32xf32>
    %cst_75 = arith.constant 1.000000e+00 : f32
    %282 = vector.broadcast %cst_75 : f32 to vector<8x32xf32>
    %283 = arith.subf %281, %282 : vector<8x32xf32>
    %284 = arith.mulf %278, %283 : vector<8x32xf32>
    %285 = arith.addf %277, %284 : vector<8x32xf32>
    %286 = vector.extract_strided_slice %275 {offsets = [0, 32], sizes = [8, 32], strides = [1, 1]} : vector<8x128xf32> to vector<8x32xf32>
    %287 = arith.mulf %286, %243 : vector<8x32xf32>
    %288 = vector.extract_strided_slice %275 {offsets = [0, 0], sizes = [8, 32], strides = [1, 1]} : vector<8x128xf32> to vector<8x32xf32>
    %289 = vector.extract_strided_slice %275 {offsets = [0, 64], sizes = [8, 32], strides = [1, 1]} : vector<8x128xf32> to vector<8x32xf32>
    %cst_76 = arith.constant 2.000000e+00 : f32
    %290 = vector.broadcast %cst_76 : f32 to vector<8x32xf32>
    %291 = arith.mulf %290, %289 : vector<8x32xf32>
    %cst_77 = arith.constant 1.000000e+00 : f32
    %292 = vector.broadcast %cst_77 : f32 to vector<8x32xf32>
    %293 = arith.subf %291, %292 : vector<8x32xf32>
    %294 = arith.mulf %288, %293 : vector<8x32xf32>
    %295 = arith.addf %287, %294 : vector<8x32xf32>
    %296 = vector.extract_strided_slice %270 {offsets = [0, 96], sizes = [8, 32], strides = [1, 1]} : vector<8x128xf32> to vector<8x32xf32>
    %297 = math.tanh %285 : vector<8x32xf32>
    %298 = arith.mulf %296, %297 : vector<8x32xf32>
    %299 = vector.extract_strided_slice %275 {offsets = [0, 96], sizes = [8, 32], strides = [1, 1]} : vector<8x128xf32> to vector<8x32xf32>
    %300 = math.tanh %295 : vector<8x32xf32>
    %301 = arith.mulf %299, %300 : vector<8x32xf32>
    %302 = arith.subf %298, %228 : vector<8x32xf32>
    %303 = vector.broadcast %256 : vector<8x1xf32> to vector<8x32xf32>
    %304 = arith.mulf %303, %302 : vector<8x32xf32>
    %305 = arith.addf %228, %304 : vector<8x32xf32>
    %306 = arith.subf %285, %232 : vector<8x32xf32>
    %307 = vector.broadcast %256 : vector<8x1xf32> to vector<8x32xf32>
    %308 = arith.mulf %307, %306 : vector<8x32xf32>
    %309 = arith.addf %232, %308 : vector<8x32xf32>
    %310 = vector.broadcast %256 : vector<8x1xf32> to vector<8x32xf32>
    %311 = arith.mulf %310, %298 : vector<8x32xf32>
    %312 = arith.addf %235, %311 : vector<8x32xf32>
    %313 = arith.subf %301, %239 : vector<8x32xf32>
    %314 = vector.broadcast %259 : vector<8x1xf32> to vector<8x32xf32>
    %315 = arith.mulf %314, %313 : vector<8x32xf32>
    %316 = arith.addf %239, %315 : vector<8x32xf32>
    %317 = arith.subf %295, %243 : vector<8x32xf32>
    %318 = vector.broadcast %259 : vector<8x1xf32> to vector<8x32xf32>
    %319 = arith.mulf %318, %317 : vector<8x32xf32>
    %320 = arith.addf %243, %319 : vector<8x32xf32>
    %321 = vector.broadcast %259 : vector<8x1xf32> to vector<8x32xf32>
    %322 = arith.mulf %321, %301 : vector<8x32xf32>
    %323 = arith.addf %246, %322 : vector<8x32xf32>
    %c4_i32 = arith.constant 4 : i32
    %c7_i32_78 = arith.constant 7 : i32
    %324 = arith.subi %c7_i32_78, %c4_i32 : i32
    %325 = arith.index_cast %c4_i32 : i32 to index
    %c0_79 = arith.constant 0 : index
    %c0_80 = arith.constant 0 : index
    %326 = vector.load %arg2[%325, %c0_79, %c0_80] : memref<8x8x128xf32, #tpu.memory_space<vmem>>, vector<1x8x128xf32>
    %327 = vector.shape_cast %326 : vector<1x8x128xf32> to vector<8x128xf32>
    %328 = arith.index_cast %324 : i32 to index
    %c0_81 = arith.constant 0 : index
    %c0_82 = arith.constant 0 : index
    %329 = vector.load %arg3[%328, %c0_81, %c0_82] : memref<8x8x128xf32, #tpu.memory_space<vmem>>, vector<1x8x128xf32>
    %330 = vector.shape_cast %329 : vector<1x8x128xf32> to vector<8x128xf32>
    %331 = arith.index_cast %c4_i32 : i32 to index
    %c0_83 = arith.constant 0 : index
    %c0_84 = arith.constant 0 : index
    %332 = vector.load %arg4[%331, %c0_83, %c0_84] : memref<8x8x1xf32, #tpu.memory_space<vmem>>, vector<1x8x1xf32>
    %333 = vector.shape_cast %332 : vector<1x8x1xf32> to vector<8x1xf32>
    %334 = arith.index_cast %324 : i32 to index
    %c0_85 = arith.constant 0 : index
    %c0_86 = arith.constant 0 : index
    %335 = vector.load %arg5[%334, %c0_85, %c0_86] : memref<8x8x1xf32, #tpu.memory_space<vmem>>, vector<1x8x1xf32>
    %336 = vector.shape_cast %335 : vector<1x8x1xf32> to vector<8x1xf32>
    %337 = tpu.concatenate %305, %316 in 1 : vector<8x32xf32>, vector<8x32xf32> -> vector<8x64xf32>
    %cst_87 = arith.constant dense<0.000000e+00> : vector<8x256xf32>
    %338 = tpu.matmul %337, %3, %cst_87 {dimension_numbers = #tpu.dot_dimension_numbers<[1], [0], [0], [1], [0, 0, 1, 1], [], []>} : vector<8x64xf32>, vector<64x256xf32>, vector<8x256xf32> -> vector<8x256xf32>
    %339 = vector.extract_strided_slice %338 {offsets = [0, 0], sizes = [8, 128], strides = [1, 1]} : vector<8x256xf32> to vector<8x128xf32>
    %340 = arith.addf %327, %339 : vector<8x128xf32>
    %341 = vector.extract_strided_slice %338 {offsets = [0, 128], sizes = [8, 128], strides = [1, 1]} : vector<8x256xf32> to vector<8x128xf32>
    %342 = arith.addf %330, %341 : vector<8x128xf32>
    %343 = arith.negf %340 : vector<8x128xf32>
    %344 = math.exp %343 : vector<8x128xf32>
    %cst_88 = arith.constant 1.000000e+00 : f32
    %345 = vector.broadcast %cst_88 : f32 to vector<8x128xf32>
    %346 = arith.addf %345, %344 : vector<8x128xf32>
    %347 = arith.divf %345, %346 : vector<8x128xf32>
    %348 = arith.negf %342 : vector<8x128xf32>
    %349 = math.exp %348 : vector<8x128xf32>
    %cst_89 = arith.constant 1.000000e+00 : f32
    %350 = vector.broadcast %cst_89 : f32 to vector<8x128xf32>
    %351 = arith.addf %350, %349 : vector<8x128xf32>
    %352 = arith.divf %350, %351 : vector<8x128xf32>
    %353 = vector.extract_strided_slice %347 {offsets = [0, 32], sizes = [8, 32], strides = [1, 1]} : vector<8x128xf32> to vector<8x32xf32>
    %354 = arith.mulf %353, %309 : vector<8x32xf32>
    %355 = vector.extract_strided_slice %347 {offsets = [0, 0], sizes = [8, 32], strides = [1, 1]} : vector<8x128xf32> to vector<8x32xf32>
    %356 = vector.extract_strided_slice %347 {offsets = [0, 64], sizes = [8, 32], strides = [1, 1]} : vector<8x128xf32> to vector<8x32xf32>
    %cst_90 = arith.constant 2.000000e+00 : f32
    %357 = vector.broadcast %cst_90 : f32 to vector<8x32xf32>
    %358 = arith.mulf %357, %356 : vector<8x32xf32>
    %cst_91 = arith.constant 1.000000e+00 : f32
    %359 = vector.broadcast %cst_91 : f32 to vector<8x32xf32>
    %360 = arith.subf %358, %359 : vector<8x32xf32>
    %361 = arith.mulf %355, %360 : vector<8x32xf32>
    %362 = arith.addf %354, %361 : vector<8x32xf32>
    %363 = vector.extract_strided_slice %352 {offsets = [0, 32], sizes = [8, 32], strides = [1, 1]} : vector<8x128xf32> to vector<8x32xf32>
    %364 = arith.mulf %363, %320 : vector<8x32xf32>
    %365 = vector.extract_strided_slice %352 {offsets = [0, 0], sizes = [8, 32], strides = [1, 1]} : vector<8x128xf32> to vector<8x32xf32>
    %366 = vector.extract_strided_slice %352 {offsets = [0, 64], sizes = [8, 32], strides = [1, 1]} : vector<8x128xf32> to vector<8x32xf32>
    %cst_92 = arith.constant 2.000000e+00 : f32
    %367 = vector.broadcast %cst_92 : f32 to vector<8x32xf32>
    %368 = arith.mulf %367, %366 : vector<8x32xf32>
    %cst_93 = arith.constant 1.000000e+00 : f32
    %369 = vector.broadcast %cst_93 : f32 to vector<8x32xf32>
    %370 = arith.subf %368, %369 : vector<8x32xf32>
    %371 = arith.mulf %365, %370 : vector<8x32xf32>
    %372 = arith.addf %364, %371 : vector<8x32xf32>
    %373 = vector.extract_strided_slice %347 {offsets = [0, 96], sizes = [8, 32], strides = [1, 1]} : vector<8x128xf32> to vector<8x32xf32>
    %374 = math.tanh %362 : vector<8x32xf32>
    %375 = arith.mulf %373, %374 : vector<8x32xf32>
    %376 = vector.extract_strided_slice %352 {offsets = [0, 96], sizes = [8, 32], strides = [1, 1]} : vector<8x128xf32> to vector<8x32xf32>
    %377 = math.tanh %372 : vector<8x32xf32>
    %378 = arith.mulf %376, %377 : vector<8x32xf32>
    %379 = arith.subf %375, %305 : vector<8x32xf32>
    %380 = vector.broadcast %333 : vector<8x1xf32> to vector<8x32xf32>
    %381 = arith.mulf %380, %379 : vector<8x32xf32>
    %382 = arith.addf %305, %381 : vector<8x32xf32>
    %383 = arith.subf %362, %309 : vector<8x32xf32>
    %384 = vector.broadcast %333 : vector<8x1xf32> to vector<8x32xf32>
    %385 = arith.mulf %384, %383 : vector<8x32xf32>
    %386 = arith.addf %309, %385 : vector<8x32xf32>
    %387 = vector.broadcast %333 : vector<8x1xf32> to vector<8x32xf32>
    %388 = arith.mulf %387, %375 : vector<8x32xf32>
    %389 = arith.addf %312, %388 : vector<8x32xf32>
    %390 = arith.subf %378, %316 : vector<8x32xf32>
    %391 = vector.broadcast %336 : vector<8x1xf32> to vector<8x32xf32>
    %392 = arith.mulf %391, %390 : vector<8x32xf32>
    %393 = arith.addf %316, %392 : vector<8x32xf32>
    %394 = arith.subf %372, %320 : vector<8x32xf32>
    %395 = vector.broadcast %336 : vector<8x1xf32> to vector<8x32xf32>
    %396 = arith.mulf %395, %394 : vector<8x32xf32>
    %397 = arith.addf %320, %396 : vector<8x32xf32>
    %398 = vector.broadcast %336 : vector<8x1xf32> to vector<8x32xf32>
    %399 = arith.mulf %398, %378 : vector<8x32xf32>
    %400 = arith.addf %323, %399 : vector<8x32xf32>
    %c5_i32 = arith.constant 5 : i32
    %c7_i32_94 = arith.constant 7 : i32
    %401 = arith.subi %c7_i32_94, %c5_i32 : i32
    %402 = arith.index_cast %c5_i32 : i32 to index
    %c0_95 = arith.constant 0 : index
    %c0_96 = arith.constant 0 : index
    %403 = vector.load %arg2[%402, %c0_95, %c0_96] : memref<8x8x128xf32, #tpu.memory_space<vmem>>, vector<1x8x128xf32>
    %404 = vector.shape_cast %403 : vector<1x8x128xf32> to vector<8x128xf32>
    %405 = arith.index_cast %401 : i32 to index
    %c0_97 = arith.constant 0 : index
    %c0_98 = arith.constant 0 : index
    %406 = vector.load %arg3[%405, %c0_97, %c0_98] : memref<8x8x128xf32, #tpu.memory_space<vmem>>, vector<1x8x128xf32>
    %407 = vector.shape_cast %406 : vector<1x8x128xf32> to vector<8x128xf32>
    %408 = arith.index_cast %c5_i32 : i32 to index
    %c0_99 = arith.constant 0 : index
    %c0_100 = arith.constant 0 : index
    %409 = vector.load %arg4[%408, %c0_99, %c0_100] : memref<8x8x1xf32, #tpu.memory_space<vmem>>, vector<1x8x1xf32>
    %410 = vector.shape_cast %409 : vector<1x8x1xf32> to vector<8x1xf32>
    %411 = arith.index_cast %401 : i32 to index
    %c0_101 = arith.constant 0 : index
    %c0_102 = arith.constant 0 : index
    %412 = vector.load %arg5[%411, %c0_101, %c0_102] : memref<8x8x1xf32, #tpu.memory_space<vmem>>, vector<1x8x1xf32>
    %413 = vector.shape_cast %412 : vector<1x8x1xf32> to vector<8x1xf32>
    %414 = tpu.concatenate %382, %393 in 1 : vector<8x32xf32>, vector<8x32xf32> -> vector<8x64xf32>
    %cst_103 = arith.constant dense<0.000000e+00> : vector<8x256xf32>
    %415 = tpu.matmul %414, %3, %cst_103 {dimension_numbers = #tpu.dot_dimension_numbers<[1], [0], [0], [1], [0, 0, 1, 1], [], []>} : vector<8x64xf32>, vector<64x256xf32>, vector<8x256xf32> -> vector<8x256xf32>
    %416 = vector.extract_strided_slice %415 {offsets = [0, 0], sizes = [8, 128], strides = [1, 1]} : vector<8x256xf32> to vector<8x128xf32>
    %417 = arith.addf %404, %416 : vector<8x128xf32>
    %418 = vector.extract_strided_slice %415 {offsets = [0, 128], sizes = [8, 128], strides = [1, 1]} : vector<8x256xf32> to vector<8x128xf32>
    %419 = arith.addf %407, %418 : vector<8x128xf32>
    %420 = arith.negf %417 : vector<8x128xf32>
    %421 = math.exp %420 : vector<8x128xf32>
    %cst_104 = arith.constant 1.000000e+00 : f32
    %422 = vector.broadcast %cst_104 : f32 to vector<8x128xf32>
    %423 = arith.addf %422, %421 : vector<8x128xf32>
    %424 = arith.divf %422, %423 : vector<8x128xf32>
    %425 = arith.negf %419 : vector<8x128xf32>
    %426 = math.exp %425 : vector<8x128xf32>
    %cst_105 = arith.constant 1.000000e+00 : f32
    %427 = vector.broadcast %cst_105 : f32 to vector<8x128xf32>
    %428 = arith.addf %427, %426 : vector<8x128xf32>
    %429 = arith.divf %427, %428 : vector<8x128xf32>
    %430 = vector.extract_strided_slice %424 {offsets = [0, 32], sizes = [8, 32], strides = [1, 1]} : vector<8x128xf32> to vector<8x32xf32>
    %431 = arith.mulf %430, %386 : vector<8x32xf32>
    %432 = vector.extract_strided_slice %424 {offsets = [0, 0], sizes = [8, 32], strides = [1, 1]} : vector<8x128xf32> to vector<8x32xf32>
    %433 = vector.extract_strided_slice %424 {offsets = [0, 64], sizes = [8, 32], strides = [1, 1]} : vector<8x128xf32> to vector<8x32xf32>
    %cst_106 = arith.constant 2.000000e+00 : f32
    %434 = vector.broadcast %cst_106 : f32 to vector<8x32xf32>
    %435 = arith.mulf %434, %433 : vector<8x32xf32>
    %cst_107 = arith.constant 1.000000e+00 : f32
    %436 = vector.broadcast %cst_107 : f32 to vector<8x32xf32>
    %437 = arith.subf %435, %436 : vector<8x32xf32>
    %438 = arith.mulf %432, %437 : vector<8x32xf32>
    %439 = arith.addf %431, %438 : vector<8x32xf32>
    %440 = vector.extract_strided_slice %429 {offsets = [0, 32], sizes = [8, 32], strides = [1, 1]} : vector<8x128xf32> to vector<8x32xf32>
    %441 = arith.mulf %440, %397 : vector<8x32xf32>
    %442 = vector.extract_strided_slice %429 {offsets = [0, 0], sizes = [8, 32], strides = [1, 1]} : vector<8x128xf32> to vector<8x32xf32>
    %443 = vector.extract_strided_slice %429 {offsets = [0, 64], sizes = [8, 32], strides = [1, 1]} : vector<8x128xf32> to vector<8x32xf32>
    %cst_108 = arith.constant 2.000000e+00 : f32
    %444 = vector.broadcast %cst_108 : f32 to vector<8x32xf32>
    %445 = arith.mulf %444, %443 : vector<8x32xf32>
    %cst_109 = arith.constant 1.000000e+00 : f32
    %446 = vector.broadcast %cst_109 : f32 to vector<8x32xf32>
    %447 = arith.subf %445, %446 : vector<8x32xf32>
    %448 = arith.mulf %442, %447 : vector<8x32xf32>
    %449 = arith.addf %441, %448 : vector<8x32xf32>
    %450 = vector.extract_strided_slice %424 {offsets = [0, 96], sizes = [8, 32], strides = [1, 1]} : vector<8x128xf32> to vector<8x32xf32>
    %451 = math.tanh %439 : vector<8x32xf32>
    %452 = arith.mulf %450, %451 : vector<8x32xf32>
    %453 = vector.extract_strided_slice %429 {offsets = [0, 96], sizes = [8, 32], strides = [1, 1]} : vector<8x128xf32> to vector<8x32xf32>
    %454 = math.tanh %449 : vector<8x32xf32>
    %455 = arith.mulf %453, %454 : vector<8x32xf32>
    %456 = arith.subf %452, %382 : vector<8x32xf32>
    %457 = vector.broadcast %410 : vector<8x1xf32> to vector<8x32xf32>
    %458 = arith.mulf %457, %456 : vector<8x32xf32>
    %459 = arith.addf %382, %458 : vector<8x32xf32>
    %460 = arith.subf %439, %386 : vector<8x32xf32>
    %461 = vector.broadcast %410 : vector<8x1xf32> to vector<8x32xf32>
    %462 = arith.mulf %461, %460 : vector<8x32xf32>
    %463 = arith.addf %386, %462 : vector<8x32xf32>
    %464 = vector.broadcast %410 : vector<8x1xf32> to vector<8x32xf32>
    %465 = arith.mulf %464, %452 : vector<8x32xf32>
    %466 = arith.addf %389, %465 : vector<8x32xf32>
    %467 = arith.subf %455, %393 : vector<8x32xf32>
    %468 = vector.broadcast %413 : vector<8x1xf32> to vector<8x32xf32>
    %469 = arith.mulf %468, %467 : vector<8x32xf32>
    %470 = arith.addf %393, %469 : vector<8x32xf32>
    %471 = arith.subf %449, %397 : vector<8x32xf32>
    %472 = vector.broadcast %413 : vector<8x1xf32> to vector<8x32xf32>
    %473 = arith.mulf %472, %471 : vector<8x32xf32>
    %474 = arith.addf %397, %473 : vector<8x32xf32>
    %475 = vector.broadcast %413 : vector<8x1xf32> to vector<8x32xf32>
    %476 = arith.mulf %475, %455 : vector<8x32xf32>
    %477 = arith.addf %400, %476 : vector<8x32xf32>
    %c6_i32 = arith.constant 6 : i32
    %c7_i32_110 = arith.constant 7 : i32
    %478 = arith.subi %c7_i32_110, %c6_i32 : i32
    %479 = arith.index_cast %c6_i32 : i32 to index
    %c0_111 = arith.constant 0 : index
    %c0_112 = arith.constant 0 : index
    %480 = vector.load %arg2[%479, %c0_111, %c0_112] : memref<8x8x128xf32, #tpu.memory_space<vmem>>, vector<1x8x128xf32>
    %481 = vector.shape_cast %480 : vector<1x8x128xf32> to vector<8x128xf32>
    %482 = arith.index_cast %478 : i32 to index
    %c0_113 = arith.constant 0 : index
    %c0_114 = arith.constant 0 : index
    %483 = vector.load %arg3[%482, %c0_113, %c0_114] : memref<8x8x128xf32, #tpu.memory_space<vmem>>, vector<1x8x128xf32>
    %484 = vector.shape_cast %483 : vector<1x8x128xf32> to vector<8x128xf32>
    %485 = arith.index_cast %c6_i32 : i32 to index
    %c0_115 = arith.constant 0 : index
    %c0_116 = arith.constant 0 : index
    %486 = vector.load %arg4[%485, %c0_115, %c0_116] : memref<8x8x1xf32, #tpu.memory_space<vmem>>, vector<1x8x1xf32>
    %487 = vector.shape_cast %486 : vector<1x8x1xf32> to vector<8x1xf32>
    %488 = arith.index_cast %478 : i32 to index
    %c0_117 = arith.constant 0 : index
    %c0_118 = arith.constant 0 : index
    %489 = vector.load %arg5[%488, %c0_117, %c0_118] : memref<8x8x1xf32, #tpu.memory_space<vmem>>, vector<1x8x1xf32>
    %490 = vector.shape_cast %489 : vector<1x8x1xf32> to vector<8x1xf32>
    %491 = tpu.concatenate %459, %470 in 1 : vector<8x32xf32>, vector<8x32xf32> -> vector<8x64xf32>
    %cst_119 = arith.constant dense<0.000000e+00> : vector<8x256xf32>
    %492 = tpu.matmul %491, %3, %cst_119 {dimension_numbers = #tpu.dot_dimension_numbers<[1], [0], [0], [1], [0, 0, 1, 1], [], []>} : vector<8x64xf32>, vector<64x256xf32>, vector<8x256xf32> -> vector<8x256xf32>
    %493 = vector.extract_strided_slice %492 {offsets = [0, 0], sizes = [8, 128], strides = [1, 1]} : vector<8x256xf32> to vector<8x128xf32>
    %494 = arith.addf %481, %493 : vector<8x128xf32>
    %495 = vector.extract_strided_slice %492 {offsets = [0, 128], sizes = [8, 128], strides = [1, 1]} : vector<8x256xf32> to vector<8x128xf32>
    %496 = arith.addf %484, %495 : vector<8x128xf32>
    %497 = arith.negf %494 : vector<8x128xf32>
    %498 = math.exp %497 : vector<8x128xf32>
    %cst_120 = arith.constant 1.000000e+00 : f32
    %499 = vector.broadcast %cst_120 : f32 to vector<8x128xf32>
    %500 = arith.addf %499, %498 : vector<8x128xf32>
    %501 = arith.divf %499, %500 : vector<8x128xf32>
    %502 = arith.negf %496 : vector<8x128xf32>
    %503 = math.exp %502 : vector<8x128xf32>
    %cst_121 = arith.constant 1.000000e+00 : f32
    %504 = vector.broadcast %cst_121 : f32 to vector<8x128xf32>
    %505 = arith.addf %504, %503 : vector<8x128xf32>
    %506 = arith.divf %504, %505 : vector<8x128xf32>
    %507 = vector.extract_strided_slice %501 {offsets = [0, 32], sizes = [8, 32], strides = [1, 1]} : vector<8x128xf32> to vector<8x32xf32>
    %508 = arith.mulf %507, %463 : vector<8x32xf32>
    %509 = vector.extract_strided_slice %501 {offsets = [0, 0], sizes = [8, 32], strides = [1, 1]} : vector<8x128xf32> to vector<8x32xf32>
    %510 = vector.extract_strided_slice %501 {offsets = [0, 64], sizes = [8, 32], strides = [1, 1]} : vector<8x128xf32> to vector<8x32xf32>
    %cst_122 = arith.constant 2.000000e+00 : f32
    %511 = vector.broadcast %cst_122 : f32 to vector<8x32xf32>
    %512 = arith.mulf %511, %510 : vector<8x32xf32>
    %cst_123 = arith.constant 1.000000e+00 : f32
    %513 = vector.broadcast %cst_123 : f32 to vector<8x32xf32>
    %514 = arith.subf %512, %513 : vector<8x32xf32>
    %515 = arith.mulf %509, %514 : vector<8x32xf32>
    %516 = arith.addf %508, %515 : vector<8x32xf32>
    %517 = vector.extract_strided_slice %506 {offsets = [0, 32], sizes = [8, 32], strides = [1, 1]} : vector<8x128xf32> to vector<8x32xf32>
    %518 = arith.mulf %517, %474 : vector<8x32xf32>
    %519 = vector.extract_strided_slice %506 {offsets = [0, 0], sizes = [8, 32], strides = [1, 1]} : vector<8x128xf32> to vector<8x32xf32>
    %520 = vector.extract_strided_slice %506 {offsets = [0, 64], sizes = [8, 32], strides = [1, 1]} : vector<8x128xf32> to vector<8x32xf32>
    %cst_124 = arith.constant 2.000000e+00 : f32
    %521 = vector.broadcast %cst_124 : f32 to vector<8x32xf32>
    %522 = arith.mulf %521, %520 : vector<8x32xf32>
    %cst_125 = arith.constant 1.000000e+00 : f32
    %523 = vector.broadcast %cst_125 : f32 to vector<8x32xf32>
    %524 = arith.subf %522, %523 : vector<8x32xf32>
    %525 = arith.mulf %519, %524 : vector<8x32xf32>
    %526 = arith.addf %518, %525 : vector<8x32xf32>
    %527 = vector.extract_strided_slice %501 {offsets = [0, 96], sizes = [8, 32], strides = [1, 1]} : vector<8x128xf32> to vector<8x32xf32>
    %528 = math.tanh %516 : vector<8x32xf32>
    %529 = arith.mulf %527, %528 : vector<8x32xf32>
    %530 = vector.extract_strided_slice %506 {offsets = [0, 96], sizes = [8, 32], strides = [1, 1]} : vector<8x128xf32> to vector<8x32xf32>
    %531 = math.tanh %526 : vector<8x32xf32>
    %532 = arith.mulf %530, %531 : vector<8x32xf32>
    %533 = arith.subf %529, %459 : vector<8x32xf32>
    %534 = vector.broadcast %487 : vector<8x1xf32> to vector<8x32xf32>
    %535 = arith.mulf %534, %533 : vector<8x32xf32>
    %536 = arith.addf %459, %535 : vector<8x32xf32>
    %537 = arith.subf %516, %463 : vector<8x32xf32>
    %538 = vector.broadcast %487 : vector<8x1xf32> to vector<8x32xf32>
    %539 = arith.mulf %538, %537 : vector<8x32xf32>
    %540 = arith.addf %463, %539 : vector<8x32xf32>
    %541 = vector.broadcast %487 : vector<8x1xf32> to vector<8x32xf32>
    %542 = arith.mulf %541, %529 : vector<8x32xf32>
    %543 = arith.addf %466, %542 : vector<8x32xf32>
    %544 = arith.subf %532, %470 : vector<8x32xf32>
    %545 = vector.broadcast %490 : vector<8x1xf32> to vector<8x32xf32>
    %546 = arith.mulf %545, %544 : vector<8x32xf32>
    %547 = arith.addf %470, %546 : vector<8x32xf32>
    %548 = arith.subf %526, %474 : vector<8x32xf32>
    %549 = vector.broadcast %490 : vector<8x1xf32> to vector<8x32xf32>
    %550 = arith.mulf %549, %548 : vector<8x32xf32>
    %551 = arith.addf %474, %550 : vector<8x32xf32>
    %552 = vector.broadcast %490 : vector<8x1xf32> to vector<8x32xf32>
    %553 = arith.mulf %552, %532 : vector<8x32xf32>
    %554 = arith.addf %477, %553 : vector<8x32xf32>
    %c7_i32_126 = arith.constant 7 : i32
    %c7_i32_127 = arith.constant 7 : i32
    %555 = arith.subi %c7_i32_127, %c7_i32_126 : i32
    %556 = arith.index_cast %c7_i32_126 : i32 to index
    %c0_128 = arith.constant 0 : index
    %c0_129 = arith.constant 0 : index
    %557 = vector.load %arg2[%556, %c0_128, %c0_129] : memref<8x8x128xf32, #tpu.memory_space<vmem>>, vector<1x8x128xf32>
    %558 = vector.shape_cast %557 : vector<1x8x128xf32> to vector<8x128xf32>
    %559 = arith.index_cast %555 : i32 to index
    %c0_130 = arith.constant 0 : index
    %c0_131 = arith.constant 0 : index
    %560 = vector.load %arg3[%559, %c0_130, %c0_131] : memref<8x8x128xf32, #tpu.memory_space<vmem>>, vector<1x8x128xf32>
    %561 = vector.shape_cast %560 : vector<1x8x128xf32> to vector<8x128xf32>
    %562 = arith.index_cast %c7_i32_126 : i32 to index
    %c0_132 = arith.constant 0 : index
    %c0_133 = arith.constant 0 : index
    %563 = vector.load %arg4[%562, %c0_132, %c0_133] : memref<8x8x1xf32, #tpu.memory_space<vmem>>, vector<1x8x1xf32>
    %564 = vector.shape_cast %563 : vector<1x8x1xf32> to vector<8x1xf32>
    %565 = arith.index_cast %555 : i32 to index
    %c0_134 = arith.constant 0 : index
    %c0_135 = arith.constant 0 : index
    %566 = vector.load %arg5[%565, %c0_134, %c0_135] : memref<8x8x1xf32, #tpu.memory_space<vmem>>, vector<1x8x1xf32>
    %567 = vector.shape_cast %566 : vector<1x8x1xf32> to vector<8x1xf32>
    %568 = tpu.concatenate %536, %547 in 1 : vector<8x32xf32>, vector<8x32xf32> -> vector<8x64xf32>
    %cst_136 = arith.constant dense<0.000000e+00> : vector<8x256xf32>
    %569 = tpu.matmul %568, %3, %cst_136 {dimension_numbers = #tpu.dot_dimension_numbers<[1], [0], [0], [1], [0, 0, 1, 1], [], []>} : vector<8x64xf32>, vector<64x256xf32>, vector<8x256xf32> -> vector<8x256xf32>
    %570 = vector.extract_strided_slice %569 {offsets = [0, 0], sizes = [8, 128], strides = [1, 1]} : vector<8x256xf32> to vector<8x128xf32>
    %571 = arith.addf %558, %570 : vector<8x128xf32>
    %572 = vector.extract_strided_slice %569 {offsets = [0, 128], sizes = [8, 128], strides = [1, 1]} : vector<8x256xf32> to vector<8x128xf32>
    %573 = arith.addf %561, %572 : vector<8x128xf32>
    %574 = arith.negf %571 : vector<8x128xf32>
    %575 = math.exp %574 : vector<8x128xf32>
    %cst_137 = arith.constant 1.000000e+00 : f32
    %576 = vector.broadcast %cst_137 : f32 to vector<8x128xf32>
    %577 = arith.addf %576, %575 : vector<8x128xf32>
    %578 = arith.divf %576, %577 : vector<8x128xf32>
    %579 = arith.negf %573 : vector<8x128xf32>
    %580 = math.exp %579 : vector<8x128xf32>
    %cst_138 = arith.constant 1.000000e+00 : f32
    %581 = vector.broadcast %cst_138 : f32 to vector<8x128xf32>
    %582 = arith.addf %581, %580 : vector<8x128xf32>
    %583 = arith.divf %581, %582 : vector<8x128xf32>
    %584 = vector.extract_strided_slice %578 {offsets = [0, 32], sizes = [8, 32], strides = [1, 1]} : vector<8x128xf32> to vector<8x32xf32>
    %585 = arith.mulf %584, %540 : vector<8x32xf32>
    %586 = vector.extract_strided_slice %578 {offsets = [0, 0], sizes = [8, 32], strides = [1, 1]} : vector<8x128xf32> to vector<8x32xf32>
    %587 = vector.extract_strided_slice %578 {offsets = [0, 64], sizes = [8, 32], strides = [1, 1]} : vector<8x128xf32> to vector<8x32xf32>
    %cst_139 = arith.constant 2.000000e+00 : f32
    %588 = vector.broadcast %cst_139 : f32 to vector<8x32xf32>
    %589 = arith.mulf %588, %587 : vector<8x32xf32>
    %cst_140 = arith.constant 1.000000e+00 : f32
    %590 = vector.broadcast %cst_140 : f32 to vector<8x32xf32>
    %591 = arith.subf %589, %590 : vector<8x32xf32>
    %592 = arith.mulf %586, %591 : vector<8x32xf32>
    %593 = arith.addf %585, %592 : vector<8x32xf32>
    %594 = vector.extract_strided_slice %583 {offsets = [0, 32], sizes = [8, 32], strides = [1, 1]} : vector<8x128xf32> to vector<8x32xf32>
    %595 = arith.mulf %594, %551 : vector<8x32xf32>
    %596 = vector.extract_strided_slice %583 {offsets = [0, 0], sizes = [8, 32], strides = [1, 1]} : vector<8x128xf32> to vector<8x32xf32>
    %597 = vector.extract_strided_slice %583 {offsets = [0, 64], sizes = [8, 32], strides = [1, 1]} : vector<8x128xf32> to vector<8x32xf32>
    %cst_141 = arith.constant 2.000000e+00 : f32
    %598 = vector.broadcast %cst_141 : f32 to vector<8x32xf32>
    %599 = arith.mulf %598, %597 : vector<8x32xf32>
    %cst_142 = arith.constant 1.000000e+00 : f32
    %600 = vector.broadcast %cst_142 : f32 to vector<8x32xf32>
    %601 = arith.subf %599, %600 : vector<8x32xf32>
    %602 = arith.mulf %596, %601 : vector<8x32xf32>
    %603 = arith.addf %595, %602 : vector<8x32xf32>
    %604 = vector.extract_strided_slice %578 {offsets = [0, 96], sizes = [8, 32], strides = [1, 1]} : vector<8x128xf32> to vector<8x32xf32>
    %605 = math.tanh %593 : vector<8x32xf32>
    %606 = arith.mulf %604, %605 : vector<8x32xf32>
    %607 = vector.extract_strided_slice %583 {offsets = [0, 96], sizes = [8, 32], strides = [1, 1]} : vector<8x128xf32> to vector<8x32xf32>
    %608 = math.tanh %603 : vector<8x32xf32>
    %609 = arith.mulf %607, %608 : vector<8x32xf32>
    %610 = arith.subf %606, %536 : vector<8x32xf32>
    %611 = vector.broadcast %564 : vector<8x1xf32> to vector<8x32xf32>
    %612 = arith.mulf %611, %610 : vector<8x32xf32>
    %613 = arith.addf %536, %612 : vector<8x32xf32>
    %614 = arith.subf %593, %540 : vector<8x32xf32>
    %615 = vector.broadcast %564 : vector<8x1xf32> to vector<8x32xf32>
    %616 = arith.mulf %615, %614 : vector<8x32xf32>
    %617 = arith.addf %540, %616 : vector<8x32xf32>
    %618 = vector.broadcast %564 : vector<8x1xf32> to vector<8x32xf32>
    %619 = arith.mulf %618, %606 : vector<8x32xf32>
    %620 = arith.addf %543, %619 : vector<8x32xf32>
    %621 = arith.subf %609, %547 : vector<8x32xf32>
    %622 = vector.broadcast %567 : vector<8x1xf32> to vector<8x32xf32>
    %623 = arith.mulf %622, %621 : vector<8x32xf32>
    %624 = arith.addf %547, %623 : vector<8x32xf32>
    %625 = arith.subf %603, %551 : vector<8x32xf32>
    %626 = vector.broadcast %567 : vector<8x1xf32> to vector<8x32xf32>
    %627 = arith.mulf %626, %625 : vector<8x32xf32>
    %628 = arith.addf %551, %627 : vector<8x32xf32>
    %629 = vector.broadcast %567 : vector<8x1xf32> to vector<8x32xf32>
    %630 = arith.mulf %629, %609 : vector<8x32xf32>
    %631 = arith.addf %554, %630 : vector<8x32xf32>
    %c8_i32 = arith.constant 8 : i32
    %c0_143 = arith.constant 0 : index
    %c0_144 = arith.constant 0 : index
    %c0_145 = arith.constant 0 : index
    %632 = vector.load %arg11[%c0_143, %c0_144, %c0_145] : memref<6x8x32xf32, #tpu.memory_space<vmem>>, vector<1x8x32xf32>
    %633 = vector.shape_cast %632 : vector<1x8x32xf32> to vector<8x32xf32>
    %634 = vector.shape_cast %613 : vector<8x32xf32> to vector<1x8x32xf32>
    tpu.vector_store %arg11[%c0_143, %c0_144, %c0_145], %634 {strides = array<i32>} : memref<6x8x32xf32, #tpu.memory_space<vmem>>, vector<1x8x32xf32>,
    %c1_146 = arith.constant 1 : index
    %c0_147 = arith.constant 0 : index
    %c0_148 = arith.constant 0 : index
    %635 = vector.load %arg11[%c1_146, %c0_147, %c0_148] : memref<6x8x32xf32, #tpu.memory_space<vmem>>, vector<1x8x32xf32>
    %636 = vector.shape_cast %635 : vector<1x8x32xf32> to vector<8x32xf32>
    %637 = vector.shape_cast %617 : vector<8x32xf32> to vector<1x8x32xf32>
    tpu.vector_store %arg11[%c1_146, %c0_147, %c0_148], %637 {strides = array<i32>} : memref<6x8x32xf32, #tpu.memory_space<vmem>>, vector<1x8x32xf32>,
    %c2_149 = arith.constant 2 : index
    %c0_150 = arith.constant 0 : index
    %c0_151 = arith.constant 0 : index
    %638 = vector.load %arg11[%c2_149, %c0_150, %c0_151] : memref<6x8x32xf32, #tpu.memory_space<vmem>>, vector<1x8x32xf32>
    %639 = vector.shape_cast %638 : vector<1x8x32xf32> to vector<8x32xf32>
    %640 = vector.shape_cast %620 : vector<8x32xf32> to vector<1x8x32xf32>
    tpu.vector_store %arg11[%c2_149, %c0_150, %c0_151], %640 {strides = array<i32>} : memref<6x8x32xf32, #tpu.memory_space<vmem>>, vector<1x8x32xf32>,
    %c3_152 = arith.constant 3 : index
    %c0_153 = arith.constant 0 : index
    %c0_154 = arith.constant 0 : index
    %641 = vector.load %arg11[%c3_152, %c0_153, %c0_154] : memref<6x8x32xf32, #tpu.memory_space<vmem>>, vector<1x8x32xf32>
    %642 = vector.shape_cast %641 : vector<1x8x32xf32> to vector<8x32xf32>
    %643 = vector.shape_cast %624 : vector<8x32xf32> to vector<1x8x32xf32>
    tpu.vector_store %arg11[%c3_152, %c0_153, %c0_154], %643 {strides = array<i32>} : memref<6x8x32xf32, #tpu.memory_space<vmem>>, vector<1x8x32xf32>,
    %c4_155 = arith.constant 4 : index
    %c0_156 = arith.constant 0 : index
    %c0_157 = arith.constant 0 : index
    %644 = vector.load %arg11[%c4_155, %c0_156, %c0_157] : memref<6x8x32xf32, #tpu.memory_space<vmem>>, vector<1x8x32xf32>
    %645 = vector.shape_cast %644 : vector<1x8x32xf32> to vector<8x32xf32>
    %646 = vector.shape_cast %628 : vector<8x32xf32> to vector<1x8x32xf32>
    tpu.vector_store %arg11[%c4_155, %c0_156, %c0_157], %646 {strides = array<i32>} : memref<6x8x32xf32, #tpu.memory_space<vmem>>, vector<1x8x32xf32>,
    %c5_158 = arith.constant 5 : index
    %c0_159 = arith.constant 0 : index
    %c0_160 = arith.constant 0 : index
    %647 = vector.load %arg11[%c5_158, %c0_159, %c0_160] : memref<6x8x32xf32, #tpu.memory_space<vmem>>, vector<1x8x32xf32>
    %648 = vector.shape_cast %647 : vector<1x8x32xf32> to vector<8x32xf32>
    %649 = vector.shape_cast %631 : vector<8x32xf32> to vector<1x8x32xf32>
    tpu.vector_store %arg11[%c5_158, %c0_159, %c0_160], %649 {strides = array<i32>} : memref<6x8x32xf32, #tpu.memory_space<vmem>>, vector<1x8x32xf32>,
    %c0_i32_161 = arith.constant 0 : i32
    %650 = arith.cmpi eq, %arg1, %c0_i32_161 : i32
    %651 = arith.extui %650 : i1 to i32
    %c0_i32_162 = arith.constant 0 : i32
    %652 = arith.cmpi ne, %651, %c0_i32_162 : i32
    scf.if %652 {
      %c0_163 = arith.constant 0 : index
      %c0_164 = arith.constant 0 : index
      %653 = vector.load %arg7[%c0_163, %c0_164] : memref<32x128xf32, #tpu.memory_space<vmem>>, vector<32x128xf32>
      %cst_165 = arith.constant dense<0.000000e+00> : vector<8x128xf32>
      %654 = tpu.matmul %620, %653, %cst_165 {dimension_numbers = #tpu.dot_dimension_numbers<[1], [0], [0], [1], [0, 0, 1, 1], [], []>} : vector<8x32xf32>, vector<32x128xf32>, vector<8x128xf32> -> vector<8x128xf32>
      %c0_166 = arith.constant 0 : index
      %c0_167 = arith.constant 0 : index
      %655 = vector.load %arg8[%c0_166, %c0_167] : memref<32x128xf32, #tpu.memory_space<vmem>>, vector<32x128xf32>
      %cst_168 = arith.constant dense<0.000000e+00> : vector<8x128xf32>
      %656 = tpu.matmul %631, %655, %cst_168 {dimension_numbers = #tpu.dot_dimension_numbers<[1], [0], [0], [1], [0, 0, 1, 1], [], []>} : vector<8x32xf32>, vector<32x128xf32>, vector<8x128xf32> -> vector<8x128xf32>
      %657 = arith.addf %654, %656 : vector<8x128xf32>
      %c0_169 = arith.constant 0 : index
      %c0_170 = arith.constant 0 : index
      %658 = vector.load %arg9[%c0_169, %c0_170] : memref<1x128xf32, #tpu.memory_space<vmem>>, vector<1x128xf32>
      %659 = vector.broadcast %658 : vector<1x128xf32> to vector<8x128xf32>
      %660 = arith.addf %657, %659 : vector<8x128xf32>
      %c0_171 = arith.constant 0 : index
      %c0_172 = arith.constant 0 : index
      %661 = vector.load %arg10[%c0_171, %c0_172] : memref<8x128xf32, #tpu.memory_space<vmem>>, vector<8x128xf32>
      tpu.vector_store %arg10[%c0_171, %c0_172], %660 {strides = array<i32>} : memref<8x128xf32, #tpu.memory_space<vmem>>, vector<8x128xf32>,
    } else {
    }
    return
  }
  func.func @transform_0(%arg0: i32, %arg1: i32) -> (i32, i32, i32) {
    %c0_i32 = arith.constant 0 : i32
    %c0_i32_0 = arith.constant 0 : i32
    return %arg1, %arg0, %c0_i32 : i32, i32, i32
  }
  func.func @transform_1(%arg0: i32, %arg1: i32) -> (i32, i32, i32) {
    %c0_i32 = arith.constant 0 : i32
    %0 = arith.subi %c0_i32, %arg1 : i32
    %c0_i32_0 = arith.constant 0 : i32
    %c0_i32_1 = arith.constant 0 : i32
    return %0, %arg0, %c0_i32_0 : i32, i32, i32
  }
  func.func @transform_2(%arg0: i32, %arg1: i32) -> (i32, i32, i32) {
    %c0_i32 = arith.constant 0 : i32
    %c0_i32_0 = arith.constant 0 : i32
    return %arg1, %arg0, %c0_i32 : i32, i32, i32
  }
  func.func @transform_3(%arg0: i32, %arg1: i32) -> (i32, i32, i32) {
    %c0_i32 = arith.constant 0 : i32
    %0 = arith.subi %c0_i32, %arg1 : i32
    %c0_i32_0 = arith.constant 0 : i32
    %c0_i32_1 = arith.constant 0 : i32
    return %0, %arg0, %c0_i32_0 : i32, i32, i32
  }
  func.func @transform_4(%arg0: i32, %arg1: i32) -> (i32, i32) {
    %c0_i32 = arith.constant 0 : i32
    %c0_i32_0 = arith.constant 0 : i32
    %c0_i32_1 = arith.constant 0 : i32
    return %c0_i32, %c0_i32_0 : i32, i32
  }
  func.func @transform_5(%arg0: i32, %arg1: i32) -> (i32, i32) {
    %c0_i32 = arith.constant 0 : i32
    %c0_i32_0 = arith.constant 0 : i32
    %c0_i32_1 = arith.constant 0 : i32
    return %c0_i32, %c0_i32_0 : i32, i32
  }
  func.func @transform_6(%arg0: i32, %arg1: i32) -> (i32, i32) {
    %c0_i32 = arith.constant 0 : i32
    %c0_i32_0 = arith.constant 0 : i32
    %c0_i32_1 = arith.constant 0 : i32
    return %c0_i32, %c0_i32_0 : i32, i32
  }
  func.func @transform_7(%arg0: i32, %arg1: i32) -> (i32, i32) {
    %c0_i32 = arith.constant 0 : i32
    %c0_i32_0 = arith.constant 0 : i32
    %c0_i32_1 = arith.constant 0 : i32
    return %c0_i32, %c0_i32_0 : i32, i32
  }
  func.func @transform_8(%arg0: i32, %arg1: i32) -> (i32, i32) {
    %c0_i32 = arith.constant 0 : i32
    %c0_i32_0 = arith.constant 0 : i32
    return %arg0, %c0_i32 : i32, i32
  }
}

</mosaic_0001>

<bundles_post_ra>
// kernel: tpu_custom_call.1
= control target key start
LH: loop header
LB: loop body
LE: loop exit
PB: predicated region body
PF: predicated region fallthrough
CT: control target
= control target key end

     0   :  { %13 = vsyncpa [#allocation4], 0  ;;  %s3131_s0 = inlined_call_operand.hbm [shape: f32[8,8,128], index: 0, kind: input, shape index: {}]   ;;  %s3132_s1 = inlined_call_operand.hbm [shape: f32[8,8,128], index: 1, kind: input, shape index: {}]   ;;  %s3133_s2 = inlined_call_operand.vmem [shape: f32[8,8,1], index: 2, kind: input, shape index: {}]   ;;  %s3134_s3 = inlined_call_operand.vmem [shape: f32[8,8,1], index: 3, kind: input, shape index: {}]   ;;  %s3135_s4 = inlined_call_operand.vmem [shape: f32[64,256], index: 4, kind: input, shape index: {}]   ;;  %s3136_s5 = inlined_call_operand.hbm [shape: f32[32,128], index: 5, kind: input, shape index: {}]   ;;  %s3137_s6 = inlined_call_operand.hbm [shape: f32[32,128], index: 6, kind: input, shape index: {}]   ;;  %s3138_s7 = inlined_call_operand.vmem [shape: f32[1,128], index: 7, kind: input, shape index: {}]   ;;  %s3139_s8 = inlined_call_operand.hbm [shape: f32[8,128], index: 8, kind: output, shape index: {}]  }
   0x1   :  { %14 = vsyncpa [#allocation7], 0 }
   0x2   :  { %15 = vsyncpa [#allocation10], 0 }
   0x3   :  { %16 = vsyncpa [#allocation5], 0  ;;  %s2301_s27 = smov [#allocation6]   ;;  %s2302_s29 = smov [#allocation3]  }
   0x4   :  { %s38_s28 = sshll.u32 %s2301_s27, 4  ;;  %s22_s30 = sshll.u32 %s2302_s29, 4  ;;  %s39_s28 = int_to_ptr.vmem [resolvable:$true] %s38_s28  ;;  %s23_s30 = int_to_ptr.vmem [resolvable:$true] %s22_s30 }
   0x5   :  { %s2201_s9 = scalar_lea.vmem %s39_s28, 1024  ;;  %p2206_p1 = scmp.lt.s32.totalorder %s39_s28, %s39_s28 }
   0x6   :  { %p2202_p0 = scmp.ne.s32.totalorder %s39_s28, %s2201_s9  ;;  %p2207_p2 = scmp.lt.s32.totalorder %s2201_s9, %s2201_s9 }
   0x8   :  { %p2208_p3 = por %p2207_p2, %p2206_p1 }
   0xa   :  { %p2209_p4 = pnand %p2208_p3, %p2202_p0 }
   0xc   :  { %2212 = shalt.err (!%p2209_p4)
}
   0xd   :  { %s2303_s10 = smov 128   ;;  %s2304_s11 = smov 8  }
   0xe   :  { %44 = dma.hbm_to_vmem [thread:$0]  %s3132_s1, 1024, %s39_s28, [#allocation7], %s2303_s10, %s2303_s10, %s2304_s11  }
   0xf   :  { %s2221_s14 = scalar_lea.vmem %s23_s30, 1024  ;;  %p2226_p6 = scmp.lt.s32.totalorder %s23_s30, %s23_s30 }
  0x10   :  { %p2222_p5 = scmp.ne.s32.totalorder %s23_s30, %s2221_s14  ;;  %p2227_p7 = scmp.lt.s32.totalorder %s2221_s14, %s2221_s14 }
  0x12   :  { %p2228_p8 = por %p2227_p7, %p2226_p6 }
  0x14   :  { %p2229_p9 = pnand %p2228_p8, %p2222_p5 }
  0x16   :  { %2232 = shalt.err (!%p2229_p9)
}
  0x17   :  { %28 = dma.hbm_to_vmem [thread:$0]  %s3131_s0, 1024, %s23_s30, [#allocation4], %s2303_s10, %s2303_s10, %s2304_s11  }
  0x18   :  { %s2305_s17 = smov [#allocation8]   ;;  %s2306_s19 = smov [#allocation9]  }
  0x19   :  { %s64_s18 = sshll.u32 %s2305_s17, 4  ;;  %s76_s20 = sshll.u32 %s2306_s19, 4  ;;  %s65_s18 = int_to_ptr.vmem [resolvable:$true] %s64_s18  ;;  %s77_s20 = int_to_ptr.vmem [resolvable:$true] %s76_s20 }
  0x1a   :  { %s2241_s1 = scalar_lea.vmem %s65_s18, 512  ;;  %p2246_p11 = scmp.lt.s32.totalorder %s65_s18, %s65_s18 }
  0x1b   :  { %p2242_p10 = scmp.ne.s32.totalorder %s65_s18, %s2241_s1  ;;  %p2247_p12 = scmp.lt.s32.totalorder %s2241_s1, %s2241_s1 }
  0x1d   :  { %p2248_p13 = por %p2247_p12, %p2246_p11 }
  0x1f   :  { %p2249_p0 = pnand %p2248_p13, %p2242_p10 }
  0x21   :  { %2252 = shalt.err (!%p2249_p0)
}
  0x22   :  { %70 = dma.hbm_to_vmem [thread:$0]  %s3136_s5, 512, %s65_s18, [#allocation7], %s2303_s10, %s2303_s10, %s2304_s11  }
  0x23   :  { %s2261_s0 = scalar_lea.vmem %s77_s20, 512  ;;  %p2266_p2 = scmp.lt.s32.totalorder %s77_s20, %s77_s20 }
  0x24   :  { %p2262_p1 = scmp.ne.s32.totalorder %s77_s20, %s2261_s0  ;;  %p2267_p3 = scmp.lt.s32.totalorder %s2261_s0, %s2261_s0 }
  0x26   :  { %p2268_p4 = por %p2267_p3, %p2266_p2 }
  0x28   :  { %p2269_p5 = pnand %p2268_p4, %p2262_p1 }
  0x2a   :  { %2272 = shalt.err (!%p2269_p5)
}
  0x2b   :  { %82 = dma.hbm_to_vmem [thread:$0]  %s3137_s6, 512, %s77_s20, [#allocation10], %s2303_s10, %s2303_s10, %s2304_s11  }
  0x2c   :  { %2293 = dma.done.wait [#allocation4], 1024  }
  0x2d   :  { %2294 = vsyncadd [#allocation4], 4294966272 }
  0x2e   :  { %2295 = dma.done.wait [#allocation7], 1536  }
  0x2f   :  { %2296 = vsyncadd [#allocation7], 4294965760 }
  0x30   :  { %2297 = dma.done.wait [#allocation10], 512  }
  0x31   :  { %2298 = vsyncadd [#allocation10], 4294966784  ;;  %vm117_vm0 = vcmask 261120   ;;  %v2307_v0 = vmov 0.0   ;;  %v2400_v1 = vld [vmem:[%s3135_s4 + $0x78] sm:$0xff]  ;;  %v2405_v2 = vld [vmem:[%s3135_s4 + $0x70] sm:$0xff] }
  0x32   :  { %121 = vst.msk [vmem:[#allocation2 + $0x18] sm:$0xff] %vm117_vm0, %v2307_v0  ;;  %118 = vst.msk [vmem:[#allocation2] sm:$0xff] %vm117_vm0, %v2307_v0  ;;  %231 = vmatprep.mubr.f32.mxu0 %v2307_v0  ;;  %435 = vmatprep.mubr.f32.mxu1 %v2307_v0  ;;  %v2410_v3 = vld [vmem:[%s3135_s4 + $0x68] sm:$0xff]  ;;  %v2418_v5 = vld [vmem:[%s3135_s4 + $0x60] sm:$0xff]  ;;  %s2308_s9 = smov 32   ;;  %vm163_vm1 = vcmask 523264  }
  0x33   :  { %119 = vst.msk [vmem:[#allocation2 + $0x8] sm:$0xff] %vm117_vm0, %v2307_v0  ;;  %120 = vst.msk [vmem:[#allocation2 + $0x10] sm:$0xff] %vm117_vm0, %v2307_v0  ;;  %183 = vmatprep.subr.mxu0 %v2400_v1  ;;  %387 = vmatprep.subr.mxu1 %v2400_v1  ;;  %v2427_v6 = vld [vmem:[%s3135_s4 + $0x58] sm:$0xff]  ;;  %v2433_v7 = vld [vmem:[%s3135_s4 + $0x50] sm:$0xff]  ;;  %v2309_v21 = vmov 0   ;;  %s2310_s30 = smov 64  }
  0x34   :  { %122 = vst.msk [vmem:[#allocation2 + $0x20] sm:$0xff] %vm117_vm0, %v2307_v0  ;;  %123 = vst.msk [vmem:[#allocation2 + $0x28] sm:$0xff] %vm117_vm0, %v2307_v0  ;;  %184 = vmatpush1.msra.mxu0 %v2405_v2  ;;  %388 = vmatpush1.msra.mxu1 %v2405_v2  ;;  %v2440_v8 = vld [vmem:[%s3135_s4 + $0x48] sm:$0xff]  ;;  %v2447_v9 = vld [vmem:[%s3135_s4 + $0x40] sm:$0xff]  ;;  %s2311_s12 = smov 96   ;;  %vm2312_vm2 = vmmov 0  }
  0x35   :  { %185 = vmatprep.subr.mxu0 %v2410_v3  ;;  %389 = vmatprep.subr.mxu1 %v2410_v3  ;;  %v2454_v10 = vld [vmem:[%s3135_s4 + $0x38] sm:$0xff]  ;;  %v2461_v11 = vld [vmem:[%s3135_s4 + $0x30] sm:$0xff]  ;;  %v2468_v12 = vld [vmem:[%s3135_s4 + $0x28] sm:$0xff] }
  0x36   :  { %186 = vmatpush1.msra.mxu0 %v2418_v5  ;;  %390 = vmatpush1.msra.mxu1 %v2418_v5  ;;  %v2475_v13 = vld [vmem:[%s3135_s4 + $0x20] sm:$0xff]  ;;  %v2482_v14 = vld [vmem:[%s3135_s4 + $0x18] sm:$0xff]  ;;  %v2489_v15 = vld [vmem:[%s3135_s4 + $0x10] sm:$0xff] }
  0x37   :  { %187 = vmatprep.subr.mxu0 %v2427_v6  ;;  %391 = vmatprep.subr.mxu1 %v2427_v6  ;;  %v2496_v16 = vld [vmem:[%s3135_s4 + $0x8] sm:$0xff]  ;;  %v2503_v17 = vld [vmem:[%s3135_s4] sm:$0xff]  ;;  %v151_v22 = vld [vmem:[#allocation3] sm:$0xff] }
  0x38   :  { %188 = vmatpush1.msra.mxu0 %v2433_v7  ;;  %392 = vmatpush1.msra.mxu1 %v2433_v7  ;;  %v153_v24 = vld [vmem:[#allocation6 + $0x38] sm:$0xff]  ;;  %v1978_v42 = vld [vmem:[%s3134_s3 + $0x38] sm:$0xff]  ;;  %v154_v56 = vld [vmem:[%s3133_s2] sm:$0xff] }
  0x39   :  { %v2412_v4 = vld [vmem:[#allocation2 + $0x18] sm:$0xff]  ;;  %189 = vmatprep.subr.mxu0 %v2440_v8  ;;  %393 = vmatprep.subr.mxu1 %v2440_v8  ;;  %v2515_v18 = vld [vmem:[#allocation2] sm:$0xff] }
  0x3a   :  { %158 = vrot.lane.b32.xlu0 %v2412_v4, %s2308_s9  ;;  %190 = vmatpush1.msra.mxu0 %v2447_v9  ;;  %v142_v41 = vld [vmem:[#allocation2 + $0x8] sm:$0xff] }
  0x3b   :  { %191 = vmatprep.subr.mxu0 %v2454_v10  ;;  %394 = vmatpush1.msra.mxu1 %v2447_v9  ;;  %v148_v40 = vld [vmem:[#allocation2 + $0x20] sm:$0xff] }
  0x3c   :  { %192 = vmatpush1.msra.mxu0 %v2461_v11  ;;  %395 = vmatprep.subr.mxu1 %v2454_v10 }
  0x3d   :  { %193 = vmatprep.subr.mxu0 %v2468_v12  ;;  %396 = vmatpush1.msra.mxu1 %v2461_v11 }
  0x3e   :  { %194 = vmatpush1.msra.mxu0 %v2475_v13  ;;  %397 = vmatprep.subr.mxu1 %v2468_v12 }
  0x3f   :  { %195 = vmatprep.subr.mxu0 %v2482_v14  ;;  %398 = vmatpush1.msra.mxu1 %v2475_v13 }
  0x40   :  { %196 = vmatpush1.msra.mxu0 %v2489_v15  ;;  %399 = vmatprep.subr.mxu1 %v2482_v14 }
  0x41   :  { %197 = vmatprep.subr.mxu0 %v2496_v16  ;;  %400 = vmatpush1.msra.mxu1 %v2489_v15 }
  0x42   :  { %198 = vmatpush1.msra.mxu0 %v2503_v17  ;;  %401 = vmatprep.subr.mxu1 %v2496_v16 }
  0x43   :  { %402 = vmatpush1.msra.mxu1 %v2503_v17  ;;  %591 = vmatprep.subr.mxu0 %v2400_v1 }
  0x44   :  { %795 = vmatprep.subr.mxu1 %v2400_v1  ;;  %2080 = vset.pattern.permute.xlu1 %v2309_v21 }
  0x45   :  { %2081 = vset.pattern.permute.xlu0 %v2309_v21 }
  0xac   :  { %v159_v19 = vpop.permute.xlu0 %158 }
  0xad   :  { %v162_v20 = vsel %vm117_vm0, %v2515_v18, %v159_v19 }
  0xae   :  { %1979 = vmatmul.mubr.msk.f32.vlgmr.msra.gmra.mxu0 %vm163_vm1, %v162_v20 }
  0xaf   :  { %592 = vmatpush1.msra.mxu0 %v2405_v2  ;;  %639 = vmatprep.mubr.f32.mxu0 %v2307_v0 }
  0xb0   :  { %593 = vmatprep.subr.mxu0 %v2410_v3 }
  0xb1   :  { %594 = vmatpush1.msra.mxu0 %v2418_v5 }
  0xb2   :  { %595 = vmatprep.subr.mxu0 %v2427_v6 }
  0xb3   :  { %596 = vmatpush1.msra.mxu0 %v2433_v7 }
  0xb4   :  { %597 = vmatprep.subr.mxu0 %v2440_v8 }
  0xb5   :  { %598 = vmatpush1.msra.mxu0 %v2447_v9 }
  0xb6   :  { %599 = vmatprep.subr.mxu0 %v2454_v10 }
  0xb7   :  { %600 = vmatpush1.msra.mxu0 %v2461_v11 }
  0xb8   :  { %601 = vmatprep.subr.mxu0 %v2468_v12 }
  0xb9   :  { %602 = vmatpush1.msra.mxu0 %v2475_v13 }
  0xba   :  { %603 = vmatprep.subr.mxu0 %v2482_v14 }
  0xbb   :  { %604 = vmatpush1.msra.mxu0 %v2489_v15 }
  0xbc   :  { %605 = vmatprep.subr.mxu0 %v2496_v16 }
  0xbd   :  { %606 = vmatpush1.msra.mxu0 %v2503_v17 }
  0xbe   :  { %999 = vmatprep.subr.mxu0 %v2400_v1 }
 0x16e   :  { %v233_v23 = vpop.f32.mrf.mxu0 }
 0x16f   :  { %v238_v25 = vadd.f32 %v233_v23, %v151_v22 }
 0x170   :  { %v235_v26 = vpop.f32.mrf.mxu0 }
 0x171   :  { %v1980_v27 = vmul.f32 -1.442695, %v238_v25  ;;  %v239_v28 = vadd.f32 %v235_v26, %v153_v24 }
 0x173   :  { %2082 = vpow2.f32 %v1980_v27  ;;  %v1981_v29 = vmul.f32 -1.442695, %v239_v28 }
 0x175   :  { %2084 = vpow2.f32 %v1981_v29 }
 0x180   :  { %v2083_v30 = vpop.eup %2082 }
 0x181   :  { %v243_v31 = vadd.f32 1.0, %v2083_v30 }
 0x182   :  { %v2085_v32 = vpop.eup %2084 }
 0x183   :  { %2086 = vrcp.f32 %v243_v31  ;;  %v249_v33 = vadd.f32 1.0, %v2085_v32 }
 0x185   :  { %2088 = vrcp.f32 %v249_v33 }
 0x190   :  { %v2087_v34 = vpop.eup %2086 }
 0x191   :  { %v257_v35 = vmul.f32 2.0, %v2087_v34 }
 0x192   :  { %v2089_v36 = vpop.eup %2088 }
 0x193   :  { %v1982_v37 = vadd.f32 -1.0, %v257_v35  ;;  %v274_v38 = vmul.f32 2.0, %v2089_v36 }
 0x195   :  { %260 = vrot.lane.b32.xlu1 %v1982_v37, %s2310_s30  ;;  %v1983_v39 = vadd.f32 -1.0, %v274_v38 }
 0x197   :  { %277 = vrot.lane.b32.xlu0 %v1983_v39, %s2310_s30 }
 0x199   :  { %270 = vrot.lane.b32.xlu1 %v148_v40, %s2308_s9 }
 0x19d   :  { %253 = vrot.lane.b32.xlu1 %v142_v41, %s2308_s9 }
 0x1a1   :  { %333 = vperm.xlu1 %2080, %v1978_v42  }
 0x1a5   :  { %327 = vrot.lane.b32.xlu1 %v2412_v4, %s2311_s12 }
 0x207   :  { %v261_v45 = vpop.permute.xlu1 %260 }
 0x208   :  { %v263_v46 = vmul.f32 %v2087_v34, %v261_v45 }
 0x209   :  { %v278_v43 = vpop.permute.xlu0 %277 }
 0x20a   :  { %v280_v44 = vmul.f32 %v2089_v36, %v278_v43 }
 0x20b   :  { %v271_v47 = vpop.permute.xlu1 %270 }
 0x20c   :  { %282 = vrot.lane.b32.xlu0 %v280_v44, %s2308_s9  ;;  %v273_v48 = vmul.f32 %v2089_v36, %v271_v47 }
 0x20f   :  { %v254_v49 = vpop.permute.xlu1 %253 }
 0x210   :  { %265 = vrot.lane.b32.xlu0 %v263_v46, %s2308_s9  ;;  %v256_v52 = vmul.f32 %v2087_v34, %v254_v49 }
 0x21c   :  { %v2555_v58 = vpop.permute.xlu1 %333 }
 0x220   :  { %v328_v59 = vpop.permute.xlu1 %327 }
 0x27e   :  { %v283_v50 = vpop.permute.xlu0 %282 }
 0x27f   :  { %v285_v51 = vadd.f32 %v283_v50, %v273_v48 }
 0x281   :  { %2090 = vtanh.f32 %v285_v51  ;;  %v342_v24 = vsub.f32 %v285_v51, %v271_v47 }
 0x282   :  { %v266_v53 = vpop.permute.xlu0 %265 }
 0x283   :  { %v268_v54 = vadd.f32 %v266_v53, %v256_v52  ;;  %v343_v26 = vmul.f32 %v342_v24, %v2555_v58 }
 0x285   :  { %2092 = vtanh.f32 %v268_v54  ;;  %v314_v27 = vsub.f32 %v268_v54, %v254_v49 }
 0x28e   :  { %v2091_v55 = vpop.eup %2090 }
 0x28f   :  { %294 = vrot.lane.b32.xlu0 %v2091_v55, %s2310_s30 }
 0x292   :  { %v2093_v57 = vpop.eup %2092 }
 0x293   :  { %288 = vrot.lane.b32.xlu1 %v2093_v57, %s2310_s30  ;;  %305 = vperm.xlu0 %2081, %v154_v56  }
 0x297   :  { %299 = vrot.lane.b32.xlu1 %v2515_v18, %s2311_s12 }
 0x301   :  { %v295_v60 = vpop.permute.xlu0 %294 }
 0x302   :  { %v2557_v61 = vmul.f32 %v2089_v36, %v295_v60 }
 0x304   :  { %v330_v62 = vsub.f32 %v2557_v61, %v328_v59 }
 0x305   :  { %v289_v63 = vpop.permute.xlu1 %288 }
 0x306   :  { %v336_v19 = vmul.f32 %v2555_v58, %v330_v62  ;;  %v2562_v21 = vmul.f32 %v2087_v34, %v289_v63 }
 0x308   :  { %338 = vrot.lane.b32.xlu0 %v336_v19, %s2308_s9 }
 0x309   :  { %v300_v20 = vpop.permute.xlu1 %299 }
 0x30a   :  { %v302_v22 = vsub.f32 %v2562_v21, %v300_v20 }
 0x30e   :  { %v2565_v23 = vpop.permute.xlu0 %305 }
 0x30f   :  { %v308_v25 = vmul.f32 %v2565_v23, %v302_v22  ;;  %v315_v28 = vmul.f32 %v314_v27, %v2565_v23 }
 0x311   :  { %310 = vrot.lane.b32.xlu1 %v308_v25, %s2308_s9 }
 0x315   :  { %345 = vrot.lane.b32.xlu1 %v343_v26, %s2311_s12 }
 0x319   :  { %317 = vrot.lane.b32.xlu1 %v315_v28, %s2311_s12  ;;  %v1984_v28 = vld [vmem:[%s3133_s2 + $0x8] sm:$0xff] }
 0x37a   :  { %v339_v29 = vpop.permute.xlu0 %338 }
 0x37b   :  { %v2574_v30 = vadd.f32 %v339_v29, %v2412_v4  ;;  %v1985_v4 = vld [vmem:[%s3134_s3 + $0x30] sm:$0xff] }
 0x37d   :  { %364 = vrot.lane.b32.xlu0 %v2574_v30, %s2308_s9 }
 0x383   :  { %v311_v31 = vpop.permute.xlu1 %310 }
 0x384   :  { %v2592_v36 = vadd.f32 %v311_v31, %v2515_v18  ;;  %v356_v18 = vld [vmem:[#allocation3 + $0x8] sm:$0xff] }
 0x387   :  { %v346_v32 = vpop.permute.xlu1 %345 }
 0x388   :  { %v2578_v33 = vadd.f32 %v346_v32, %v148_v40  ;;  %v358_v40 = vld [vmem:[#allocation6 + $0x30] sm:$0xff] }
 0x38a   :  { %474 = vrot.lane.b32.xlu1 %v2578_v33, %s2308_s9 }
 0x38b   :  { %v318_v34 = vpop.permute.xlu1 %317 }
 0x38c   :  { %v2582_v35 = vadd.f32 %v318_v34, %v142_v41 }
 0x38e   :  { %457 = vrot.lane.b32.xlu1 %v2582_v35, %s2308_s9 }
 0x392   :  { %537 = vperm.xlu1 %2080, %v1985_v4  }
 0x396   :  { %531 = vrot.lane.b32.xlu1 %v2574_v30, %s2311_s12 }
 0x3ef   :  { %v365_v37 = vpop.permute.xlu0 %364 }
 0x3f0   :  { %v367_v38 = vsel %vm117_vm0, %v2592_v36, %v365_v37 }
 0x3f1   :  { %1986 = vmatmul.mubr.msk.f32.vlgmr.msra.gmra.mxu1 %vm163_vm1, %v367_v38 }
 0x3f2   :  { %796 = vmatpush1.msra.mxu1 %v2405_v2  ;;  %843 = vmatprep.mubr.f32.mxu1 %v2307_v0 }
 0x3f3   :  { %797 = vmatprep.subr.mxu1 %v2410_v3 }
 0x3f4   :  { %798 = vmatpush1.msra.mxu1 %v2418_v5 }
 0x3f5   :  { %799 = vmatprep.subr.mxu1 %v2427_v6 }
 0x3f6   :  { %800 = vmatpush1.msra.mxu1 %v2433_v7 }
 0x3f7   :  { %801 = vmatprep.subr.mxu1 %v2440_v8 }
 0x3f8   :  { %802 = vmatpush1.msra.mxu1 %v2447_v9 }
 0x3f9   :  { %803 = vmatprep.subr.mxu1 %v2454_v10 }
 0x3fa   :  { %804 = vmatpush1.msra.mxu1 %v2461_v11 }
 0x3fb   :  { %805 = vmatprep.subr.mxu1 %v2468_v12 }
 0x3fc   :  { %806 = vmatpush1.msra.mxu1 %v2475_v13  ;;  %v475_v62 = vpop.permute.xlu1 %474 }
 0x3fd   :  { %807 = vmatprep.subr.mxu1 %v2482_v14 }
 0x3fe   :  { %808 = vmatpush1.msra.mxu1 %v2489_v15 }
 0x3ff   :  { %809 = vmatprep.subr.mxu1 %v2496_v16 }
 0x400   :  { %810 = vmatpush1.msra.mxu1 %v2503_v17  ;;  %v458_v22 = vpop.permute.xlu1 %457 }
 0x401   :  { %1203 = vmatprep.subr.mxu1 %v2400_v1 }
 0x40d   :  { %v2625_v31 = vpop.permute.xlu1 %537 }
 0x411   :  { %v532_v4 = vpop.permute.xlu1 %531 }
 0x4b1   :  { %v437_v39 = vpop.f32.mrf.mxu1 }
 0x4b2   :  { %v442_v41 = vadd.f32 %v437_v39, %v356_v18 }
 0x4b3   :  { %v439_v42 = vpop.f32.mrf.mxu1 }
 0x4b4   :  { %v1987_v43 = vmul.f32 -1.442695, %v442_v41  ;;  %v443_v44 = vadd.f32 %v439_v42, %v358_v40 }
 0x4b6   :  { %2094 = vpow2.f32 %v1987_v43  ;;  %v1988_v45 = vmul.f32 -1.442695, %v443_v44 }
 0x4b8   :  { %2096 = vpow2.f32 %v1988_v45 }
 0x4c3   :  { %v2095_v46 = vpop.eup %2094 }
 0x4c4   :  { %v447_v47 = vadd.f32 1.0, %v2095_v46 }
 0x4c5   :  { %v2097_v48 = vpop.eup %2096 }
 0x4c6   :  { %v453_v49 = vadd.f32 1.0, %v2097_v48  ;;  %2098 = vrcp.f32 %v447_v47 }
 0x4c8   :  { %2100 = vrcp.f32 %v453_v49 }
 0x4d3   :  { %v2099_v50 = vpop.eup %2098 }
 0x4d4   :  { %v461_v54 = vmul.f32 2.0, %v2099_v50  ;;  %v460_v24 = vmul.f32 %v2099_v50, %v458_v22 }
 0x4d5   :  { %v2101_v51 = vpop.eup %2100 }
 0x4d6   :  { %v478_v52 = vmul.f32 2.0, %v2101_v51  ;;  %v1989_v55 = vadd.f32 -1.0, %v461_v54  ;;  %v477_v63 = vmul.f32 %v2101_v51, %v475_v62 }
 0x4d8   :  { %v1990_v53 = vadd.f32 -1.0, %v478_v52 }
 0x4da   :  { %481 = vrot.lane.b32.xlu0 %v1990_v53, %s2310_s30 }
 0x4de   :  { %464 = vrot.lane.b32.xlu0 %v1989_v55, %s2310_s30 }
 0x54c   :  { %v482_v56 = vpop.permute.xlu0 %481 }
 0x54d   :  { %v484_v57 = vmul.f32 %v2101_v51, %v482_v56 }
 0x54f   :  { %486 = vrot.lane.b32.xlu0 %v484_v57, %s2308_s9  ;;  %v562_v57 = vld [vmem:[#allocation6 + $0x28] sm:$0xff] }
 0x550   :  { %v465_v59 = vpop.permute.xlu0 %464 }
 0x551   :  { %v467_v60 = vmul.f32 %v2099_v50, %v465_v59 }
 0x553   :  { %469 = vrot.lane.b32.xlu0 %v467_v60, %s2308_s9 }
 0x5c1   :  { %v487_v19 = vpop.permute.xlu0 %486 }
 0x5c2   :  { %v489_v20 = vadd.f32 %v487_v19, %v477_v63 }
 0x5c4   :  { %2102 = vtanh.f32 %v489_v20  ;;  %v546_v43 = vsub.f32 %v489_v20, %v475_v62 }
 0x5c5   :  { %v470_v25 = vpop.permute.xlu0 %469 }
 0x5c6   :  { %v472_v26 = vadd.f32 %v470_v25, %v460_v24  ;;  %v547_v45 = vmul.f32 %v546_v43, %v2625_v31 }
 0x5c8   :  { %2104 = vtanh.f32 %v472_v26  ;;  %v518_v46 = vsub.f32 %v472_v26, %v458_v22 }
 0x5d1   :  { %v2103_v27 = vpop.eup %2102 }
 0x5d2   :  { %498 = vrot.lane.b32.xlu0 %v2103_v27, %s2310_s30 }
 0x5d5   :  { %v2105_v29 = vpop.eup %2104 }
 0x5d6   :  { %492 = vrot.lane.b32.xlu1 %v2105_v29, %s2310_s30  ;;  %509 = vperm.xlu0 %2081, %v1984_v28  }
 0x5da   :  { %503 = vrot.lane.b32.xlu0 %v2592_v36, %s2311_s12 }
 0x644   :  { %v499_v32 = vpop.permute.xlu0 %498 }
 0x645   :  { %v2627_v34 = vmul.f32 %v2101_v51, %v499_v32 }
 0x647   :  { %v534_v37 = vsub.f32 %v2627_v34, %v532_v4 }
 0x648   :  { %v493_v18 = vpop.permute.xlu1 %492 }
 0x649   :  { %v540_v38 = vmul.f32 %v2625_v31, %v534_v37  ;;  %v2634_v40 = vmul.f32 %v2099_v50, %v493_v18 }
 0x64b   :  { %542 = vrot.lane.b32.xlu1 %v540_v38, %s2308_s9 }
 0x651   :  { %v2632_v39 = vpop.permute.xlu0 %509 }
 0x652   :  { %v519_v47 = vmul.f32 %v518_v46, %v2632_v39 }
 0x655   :  { %v504_v41 = vpop.permute.xlu0 %503 }
 0x656   :  { %v506_v42 = vsub.f32 %v2634_v40, %v504_v41 }
 0x658   :  { %v512_v44 = vmul.f32 %v2632_v39, %v506_v42 }
 0x65a   :  { %514 = vrot.lane.b32.xlu0 %v512_v44, %s2308_s9 }
 0x65e   :  { %549 = vrot.lane.b32.xlu0 %v547_v45, %s2311_s12 }
 0x662   :  { %521 = vrot.lane.b32.xlu0 %v519_v47, %s2311_s12 }
 0x6bd   :  { %v543_v48 = vpop.permute.xlu1 %542 }
 0x6be   :  { %v2644_v49 = vadd.f32 %v543_v48, %v2574_v30  ;;  %v1992_v30 = vld [vmem:[%s3134_s3 + $0x28] sm:$0xff] }
 0x6c0   :  { %568 = vrot.lane.b32.xlu1 %v2644_v49, %s2308_s9 }
 0x6cc   :  { %v515_v50 = vpop.permute.xlu0 %514 }
 0x6d0   :  { %v550_v51 = vpop.permute.xlu0 %549 }
 0x6d1   :  { %v2649_v52 = vadd.f32 %v550_v51, %v2578_v33  ;;  %v2664_v33 = vadd.f32 %v515_v50, %v2592_v36 }
 0x6d3   :  { %678 = vrot.lane.b32.xlu0 %v2649_v52, %s2308_s9 }
 0x6d4   :  { %v522_v53 = vpop.permute.xlu0 %521 }
 0x6d5   :  { %v2654_v54 = vadd.f32 %v522_v53, %v2582_v35  ;;  %v560_v35 = vld [vmem:[#allocation3 + $0x10] sm:$0xff]  ;;  %v1991_v53 = vld [vmem:[%s3133_s2 + $0x10] sm:$0xff] }
 0x6d7   :  { %661 = vrot.lane.b32.xlu0 %v2654_v54, %s2308_s9 }
 0x6db   :  { %741 = vperm.xlu0 %2081, %v1992_v30  }
 0x6df   :  { %735 = vrot.lane.b32.xlu0 %v2644_v49, %s2311_s12 }
 0x732   :  { %v569_v55 = vpop.permute.xlu1 %568 }
 0x733   :  { %v571_v56 = vsel %vm117_vm0, %v2664_v33, %v569_v55 }
 0x734   :  { %1993 = vmatmul.mubr.msk.f32.vlgmr.msra.gmra.mxu0 %vm163_vm1, %v571_v56 }
 0x735   :  { %1000 = vmatpush1.msra.mxu0 %v2405_v2  ;;  %1047 = vmatprep.mubr.f32.mxu0 %v2307_v0 }
 0x736   :  { %1001 = vmatprep.subr.mxu0 %v2410_v3 }
 0x737   :  { %1002 = vmatpush1.msra.mxu0 %v2418_v5 }
 0x738   :  { %1003 = vmatprep.subr.mxu0 %v2427_v6 }
 0x739   :  { %1004 = vmatpush1.msra.mxu0 %v2433_v7 }
 0x73a   :  { %1005 = vmatprep.subr.mxu0 %v2440_v8 }
 0x73b   :  { %1006 = vmatpush1.msra.mxu0 %v2447_v9 }
 0x73c   :  { %1007 = vmatprep.subr.mxu0 %v2454_v10 }
 0x73d   :  { %1008 = vmatpush1.msra.mxu0 %v2461_v11 }
 0x73e   :  { %1009 = vmatprep.subr.mxu0 %v2468_v12 }
 0x73f   :  { %1010 = vmatpush1.msra.mxu0 %v2475_v13 }
 0x740   :  { %1011 = vmatprep.subr.mxu0 %v2482_v14 }
 0x741   :  { %1012 = vmatpush1.msra.mxu0 %v2489_v15 }
 0x742   :  { %1013 = vmatprep.subr.mxu0 %v2496_v16 }
 0x743   :  { %1014 = vmatpush1.msra.mxu0 %v2503_v17 }
 0x744   :  { %1407 = vmatprep.subr.mxu0 %v2400_v1 }
 0x745   :  { %v679_v42 = vpop.permute.xlu0 %678 }
 0x749   :  { %v662_v46 = vpop.permute.xlu0 %661 }
 0x756   :  { %v2697_v55 = vpop.permute.xlu0 %741 }
 0x7f4   :  { %v641_v36 = vpop.f32.mrf.mxu0 }
 0x7f5   :  { %v646_v59 = vadd.f32 %v641_v36, %v560_v35  ;;  %v736_v36 = vpop.permute.xlu0 %735 }
 0x7f6   :  { %v643_v60 = vpop.f32.mrf.mxu0 }
 0x7f7   :  { %v1994_v62 = vmul.f32 -1.442695, %v646_v59  ;;  %v647_v63 = vadd.f32 %v643_v60, %v562_v57 }
 0x7f9   :  { %2106 = vpow2.f32 %v1994_v62  ;;  %v1995_v19 = vmul.f32 -1.442695, %v647_v63 }
 0x7fb   :  { %2108 = vpow2.f32 %v1995_v19 }
 0x806   :  { %v2107_v20 = vpop.eup %2106 }
 0x807   :  { %v651_v22 = vadd.f32 1.0, %v2107_v20 }
 0x808   :  { %v2109_v24 = vpop.eup %2108 }
 0x809   :  { %v657_v25 = vadd.f32 1.0, %v2109_v24  ;;  %2110 = vrcp.f32 %v651_v22 }
 0x80b   :  { %2112 = vrcp.f32 %v657_v25 }
 0x816   :  { %v2111_v26 = vpop.eup %2110 }
 0x817   :  { %v665_v32 = vmul.f32 2.0, %v2111_v26  ;;  %v664_v47 = vmul.f32 %v2111_v26, %v662_v46 }
 0x818   :  { %v2113_v27 = vpop.eup %2112 }
 0x819   :  { %v682_v28 = vmul.f32 2.0, %v2113_v27  ;;  %v1996_v4 = vadd.f32 -1.0, %v665_v32  ;;  %v681_v43 = vmul.f32 %v2113_v27, %v679_v42 }
 0x81b   :  { %v1997_v29 = vadd.f32 -1.0, %v682_v28 }
 0x81d   :  { %685 = vrot.lane.b32.xlu1 %v1997_v29, %s2310_s30 }
 0x821   :  { %668 = vrot.lane.b32.xlu1 %v1996_v4, %s2310_s30 }
 0x88f   :  { %v686_v37 = vpop.permute.xlu1 %685 }
 0x890   :  { %v688_v38 = vmul.f32 %v2113_v27, %v686_v37 }
 0x892   :  { %690 = vrot.lane.b32.xlu1 %v688_v38, %s2308_s9 }
 0x893   :  { %v669_v18 = vpop.permute.xlu1 %668 }
 0x894   :  { %v671_v41 = vmul.f32 %v2111_v26, %v669_v18 }
 0x896   :  { %673 = vrot.lane.b32.xlu1 %v671_v41, %s2308_s9 }
 0x904   :  { %v691_v44 = vpop.permute.xlu1 %690 }
 0x905   :  { %v693_v45 = vadd.f32 %v691_v44, %v681_v43  ;;  %v766_v43 = vld [vmem:[#allocation6 + $0x20] sm:$0xff] }
 0x907   :  { %2114 = vtanh.f32 %v693_v45  ;;  %v750_v22 = vsub.f32 %v693_v45, %v679_v42 }
 0x908   :  { %v674_v48 = vpop.permute.xlu1 %673 }
 0x909   :  { %v676_v50 = vadd.f32 %v674_v48, %v664_v47  ;;  %v751_v25 = vmul.f32 %v750_v22, %v2697_v55 }
 0x90b   :  { %2116 = vtanh.f32 %v676_v50 }
 0x914   :  { %v2115_v51 = vpop.eup %2114 }
 0x915   :  { %702 = vrot.lane.b32.xlu1 %v2115_v51, %s2310_s30 }
 0x918   :  { %v2117_v30 = vpop.eup %2116 }
 0x919   :  { %713 = vperm.xlu1 %2080, %v1991_v53   ;;  %696 = vrot.lane.b32.xlu0 %v2117_v30, %s2310_s30 }
 0x91d   :  { %707 = vrot.lane.b32.xlu1 %v2664_v33, %s2311_s12 }
 0x987   :  { %v703_v56 = vpop.permute.xlu1 %702 }
 0x988   :  { %v2699_v35 = vmul.f32 %v2113_v27, %v703_v56  ;;  %v722_v27 = vsub.f32 %v676_v50, %v662_v46 }
 0x98a   :  { %v738_v57 = vsub.f32 %v2699_v35, %v736_v36 }
 0x98b   :  { %v697_v60 = vpop.permute.xlu0 %696 }
 0x98c   :  { %v744_v59 = vmul.f32 %v2697_v55, %v738_v57  ;;  %v2706_v63 = vmul.f32 %v2111_v26, %v697_v60 }
 0x98e   :  { %746 = vrot.lane.b32.xlu0 %v744_v59, %s2308_s9 }
 0x994   :  { %v2704_v62 = vpop.permute.xlu1 %713 }
 0x995   :  { %v723_v28 = vmul.f32 %v722_v27, %v2704_v62 }
 0x998   :  { %v708_v19 = vpop.permute.xlu1 %707 }
 0x999   :  { %v710_v20 = vsub.f32 %v2706_v63, %v708_v19 }
 0x99b   :  { %v716_v24 = vmul.f32 %v2704_v62, %v710_v20 }
 0x99d   :  { %718 = vrot.lane.b32.xlu1 %v716_v24, %s2308_s9 }
 0x9a1   :  { %753 = vrot.lane.b32.xlu1 %v751_v25, %s2311_s12 }
 0x9a5   :  { %725 = vrot.lane.b32.xlu1 %v723_v28, %s2311_s12 }
 0xa00   :  { %v747_v29 = vpop.permute.xlu0 %746 }
 0xa01   :  { %v2716_v26 = vadd.f32 %v747_v29, %v2644_v49  ;;  %v1999_v49 = vld [vmem:[%s3134_s3 + $0x20] sm:$0xff] }
 0xa03   :  { %772 = vrot.lane.b32.xlu0 %v2716_v26, %s2308_s9 }
 0xa0f   :  { %v719_v32 = vpop.permute.xlu1 %718 }
 0xa13   :  { %v754_v4 = vpop.permute.xlu1 %753 }
 0xa14   :  { %v2721_v37 = vadd.f32 %v754_v4, %v2649_v52  ;;  %v2736_v52 = vadd.f32 %v719_v32, %v2664_v33 }
 0xa16   :  { %882 = vrot.lane.b32.xlu1 %v2721_v37, %s2308_s9 }
 0xa17   :  { %v726_v38 = vpop.permute.xlu1 %725 }
 0xa18   :  { %v2726_v18 = vadd.f32 %v726_v38, %v2654_v54  ;;  %v764_v54 = vld [vmem:[#allocation3 + $0x18] sm:$0xff] }
 0xa1a   :  { %865 = vrot.lane.b32.xlu1 %v2726_v18, %s2308_s9 }
 0xa1e   :  { %945 = vperm.xlu1 %2080, %v1999_v49  }
 0xa22   :  { %939 = vrot.lane.b32.xlu1 %v2716_v26, %s2311_s12 }
 0xa75   :  { %v773_v41 = vpop.permute.xlu0 %772 }
 0xa76   :  { %v775_v42 = vsel %vm117_vm0, %v2736_v52, %v773_v41 }
 0xa77   :  { %2000 = vmatmul.mubr.msk.f32.vlgmr.msra.gmra.mxu1 %vm163_vm1, %v775_v42  ;;  %v1998_v42 = vld [vmem:[%s3133_s2 + $0x18] sm:$0xff] }
 0xa78   :  { %1204 = vmatpush1.msra.mxu1 %v2405_v2  ;;  %1251 = vmatprep.mubr.f32.mxu1 %v2307_v0 }
 0xa79   :  { %1205 = vmatprep.subr.mxu1 %v2410_v3 }
 0xa7a   :  { %1206 = vmatpush1.msra.mxu1 %v2418_v5 }
 0xa7b   :  { %1207 = vmatprep.subr.mxu1 %v2427_v6 }
 0xa7c   :  { %1208 = vmatpush1.msra.mxu1 %v2433_v7 }
 0xa7d   :  { %1209 = vmatprep.subr.mxu1 %v2440_v8 }
 0xa7e   :  { %1210 = vmatpush1.msra.mxu1 %v2447_v9 }
 0xa7f   :  { %1211 = vmatprep.subr.mxu1 %v2454_v10 }
 0xa80   :  { %1212 = vmatpush1.msra.mxu1 %v2461_v11 }
 0xa81   :  { %1213 = vmatprep.subr.mxu1 %v2468_v12 }
 0xa82   :  { %1214 = vmatpush1.msra.mxu1 %v2475_v13 }
 0xa83   :  { %1215 = vmatprep.subr.mxu1 %v2482_v14 }
 0xa84   :  { %1216 = vmatpush1.msra.mxu1 %v2489_v15 }
 0xa85   :  { %1217 = vmatprep.subr.mxu1 %v2496_v16 }
 0xa86   :  { %1218 = vmatpush1.msra.mxu1 %v2503_v17 }
 0xa87   :  { %1609 = vmatprep.subr.mxu1 %v2400_v1 }
 0xa88   :  { %v883_v25 = vpop.permute.xlu1 %882 }
 0xa8c   :  { %v866_v32 = vpop.permute.xlu1 %865 }
 0xb37   :  { %v845_v33 = vpop.f32.mrf.mxu1 }
 0xb38   :  { %v850_v44 = vadd.f32 %v845_v33, %v764_v54  ;;  %v2769_v33 = vpop.permute.xlu1 %945 }
 0xb39   :  { %v847_v45 = vpop.f32.mrf.mxu1 }
 0xb3a   :  { %v2001_v46 = vmul.f32 -1.442695, %v850_v44  ;;  %v851_v47 = vadd.f32 %v847_v45, %v766_v43 }
 0xb3c   :  { %2118 = vpow2.f32 %v2001_v46  ;;  %v2002_v48 = vmul.f32 -1.442695, %v851_v47  ;;  %v940_v45 = vpop.permute.xlu1 %939 }
 0xb3e   :  { %2120 = vpow2.f32 %v2002_v48 }
 0xb49   :  { %v2119_v50 = vpop.eup %2118 }
 0xb4a   :  { %v855_v51 = vadd.f32 1.0, %v2119_v50 }
 0xb4b   :  { %v2121_v53 = vpop.eup %2120 }
 0xb4c   :  { %v861_v30 = vadd.f32 1.0, %v2121_v53  ;;  %2122 = vrcp.f32 %v855_v51 }
 0xb4e   :  { %2124 = vrcp.f32 %v861_v30 }
 0xb59   :  { %v2123_v56 = vpop.eup %2122 }
 0xb5a   :  { %v869_v59 = vmul.f32 2.0, %v2123_v56  ;;  %v868_v4 = vmul.f32 %v2123_v56, %v866_v32 }
 0xb5b   :  { %v2125_v36 = vpop.eup %2124 }
 0xb5c   :  { %v886_v57 = vmul.f32 2.0, %v2125_v36  ;;  %v2003_v60 = vadd.f32 -1.0, %v869_v59  ;;  %v885_v27 = vmul.f32 %v2125_v36, %v883_v25 }
 0xb5e   :  { %v2004_v1 = vadd.f32 -1.0, %v886_v57 }
 0xb60   :  { %889 = vrot.lane.b32.xlu0 %v2004_v1, %s2310_s30 }
 0xb64   :  { %872 = vrot.lane.b32.xlu0 %v2003_v60, %s2310_s30 }
 0xbd2   :  { %v890_v19 = vpop.permute.xlu0 %889 }
 0xbd3   :  { %v892_v20 = vmul.f32 %v2125_v36, %v890_v19 }
 0xbd5   :  { %894 = vrot.lane.b32.xlu0 %v892_v20, %s2308_s9 }
 0xbd6   :  { %v873_v22 = vpop.permute.xlu0 %872 }
 0xbd7   :  { %v875_v24 = vmul.f32 %v2123_v56, %v873_v22 }
 0xbd9   :  { %877 = vrot.lane.b32.xlu0 %v875_v24, %s2308_s9 }
 0xc47   :  { %v895_v28 = vpop.permute.xlu0 %894 }
 0xc48   :  { %v897_v29 = vadd.f32 %v895_v28, %v885_v27 }
 0xc4a   :  { %2126 = vtanh.f32 %v897_v29  ;;  %v954_v1 = vsub.f32 %v897_v29, %v883_v25 }
 0xc4b   :  { %v878_v38 = vpop.permute.xlu0 %877 }
 0xc4c   :  { %v880_v49 = vadd.f32 %v878_v38, %v868_v4 }
 0xc4e   :  { %2128 = vtanh.f32 %v880_v49  ;;  %v926_v60 = vsub.f32 %v880_v49, %v866_v32 }
 0xc57   :  { %v2127_v41 = vpop.eup %2126 }
 0xc58   :  { %906 = vrot.lane.b32.xlu0 %v2127_v41, %s2310_s30 }
 0xc5b   :  { %v2129_v54 = vpop.eup %2128 }
 0xc5c   :  { %900 = vrot.lane.b32.xlu1 %v2129_v54, %s2310_s30  ;;  %917 = vperm.xlu0 %2081, %v1998_v42  }
 0xc60   :  { %911 = vrot.lane.b32.xlu0 %v2736_v52, %s2311_s12 }
 0xcca   :  { %v907_v43 = vpop.permute.xlu0 %906 }
 0xccb   :  { %v2771_v44 = vmul.f32 %v2125_v36, %v907_v43  ;;  %v955_v36 = vmul.f32 %v954_v1, %v2769_v33 }
 0xccd   :  { %v942_v46 = vsub.f32 %v2771_v44, %v940_v45 }
 0xcce   :  { %v901_v48 = vpop.permute.xlu1 %900 }
 0xccf   :  { %v948_v47 = vmul.f32 %v2769_v33, %v942_v46  ;;  %v903_v50 = vmul.f32 %v2123_v56, %v901_v48 }
 0xcd1   :  { %950 = vrot.lane.b32.xlu1 %v948_v47, %s2308_s9 }
 0xcd7   :  { %v918_v51 = vpop.permute.xlu0 %917 }
 0xcd8   :  { %v2776_v53 = vmul.f32 %v918_v51, %v903_v50  ;;  %v927_v19 = vmul.f32 %v926_v60, %v918_v51 }
 0xcdb   :  { %v912_v30 = vpop.permute.xlu0 %911 }
 0xcdc   :  { %v914_v57 = vsub.f32 %v903_v50, %v912_v30 }
 0xcde   :  { %v920_v59 = vmul.f32 %v918_v51, %v914_v57  ;;  %v2005_v57 = vld [vmem:[%s3133_s2 + $0x20] sm:$0xff] }
 0xce0   :  { %922 = vrot.lane.b32.xlu0 %v920_v59, %s2308_s9 }
 0xce4   :  { %957 = vrot.lane.b32.xlu0 %v955_v36, %s2311_s12 }
 0xce8   :  { %929 = vrot.lane.b32.xlu0 %v927_v19, %s2311_s12 }
 0xd43   :  { %v951_v20 = vpop.permute.xlu1 %950 }
 0xd44   :  { %v2783_v56 = vadd.f32 %v951_v20, %v2716_v26  ;;  %v2006_v26 = vld [vmem:[%s3134_s3 + $0x18] sm:$0xff] }
 0xd46   :  { %976 = vrot.lane.b32.xlu1 %v2783_v56, %s2308_s9 }
 0xd52   :  { %v923_v22 = vpop.permute.xlu0 %922 }
 0xd56   :  { %v958_v24 = vpop.permute.xlu0 %957 }
 0xd57   :  { %v2788_v25 = vadd.f32 %v958_v24, %v2721_v37  ;;  %v2803_v37 = vadd.f32 %v923_v22, %v2736_v52 }
 0xd59   :  { %1086 = vrot.lane.b32.xlu0 %v2788_v25, %s2308_s9 }
 0xd5a   :  { %v930_v27 = vpop.permute.xlu0 %929 }
 0xd5b   :  { %v2793_v28 = vadd.f32 %v930_v27, %v2726_v18 }
 0xd5d   :  { %1069 = vrot.lane.b32.xlu0 %v2793_v28, %s2308_s9 }
 0xd61   :  { %1149 = vperm.xlu0 %2081, %v2006_v26  }
 0xd65   :  { %1143 = vrot.lane.b32.xlu0 %v2783_v56, %s2311_s12 }
 0xdb8   :  { %v977_v29 = vpop.permute.xlu1 %976 }
 0xdb9   :  { %v979_v32 = vsel %vm117_vm0, %v2803_v37, %v977_v29 }
 0xdba   :  { %2007 = vmatmul.mubr.msk.f32.vlgmr.msra.gmra.mxu0 %vm163_vm1, %v979_v32 }
 0xdbb   :  { %1408 = vmatpush1.msra.mxu0 %v2405_v2  ;;  %1455 = vmatprep.mubr.f32.mxu0 %v2307_v0  ;;  %v968_v2 = vld [vmem:[#allocation3 + $0x20] sm:$0xff] }
 0xdbc   :  { %1409 = vmatprep.subr.mxu0 %v2410_v3 }
 0xdbd   :  { %1410 = vmatpush1.msra.mxu0 %v2418_v5  ;;  %v970_v5 = vld [vmem:[#allocation6 + $0x18] sm:$0xff] }
 0xdbe   :  { %1411 = vmatprep.subr.mxu0 %v2427_v6 }
 0xdbf   :  { %1412 = vmatpush1.msra.mxu0 %v2433_v7 }
 0xdc0   :  { %1413 = vmatprep.subr.mxu0 %v2440_v8 }
 0xdc1   :  { %1414 = vmatpush1.msra.mxu0 %v2447_v9 }
 0xdc2   :  { %1415 = vmatprep.subr.mxu0 %v2454_v10 }
 0xdc3   :  { %1416 = vmatpush1.msra.mxu0 %v2461_v11 }
 0xdc4   :  { %1417 = vmatprep.subr.mxu0 %v2468_v12 }
 0xdc5   :  { %1418 = vmatpush1.msra.mxu0 %v2475_v13 }
 0xdc6   :  { %1419 = vmatprep.subr.mxu0 %v2482_v14 }
 0xdc7   :  { %1420 = vmatpush1.msra.mxu0 %v2489_v15 }
 0xdc8   :  { %1421 = vmatprep.subr.mxu0 %v2496_v16 }
 0xdc9   :  { %1422 = vmatpush1.msra.mxu0 %v2503_v17 }
 0xdca   :  { %2045 = vmatprep.subr.mxu0 %v2307_v0 }
 0xdcb   :  { %v1087_v54 = vpop.permute.xlu0 %1086 }
 0xdcf   :  { %v1070_v47 = vpop.permute.xlu0 %1069 }
 0xddc   :  { %v2836_v59 = vpop.permute.xlu0 %1149 }
 0xde0   :  { %v1144_v19 = vpop.permute.xlu0 %1143 }
 0xe7a   :  { %v1049_v3 = vpop.f32.mrf.mxu0 }
 0xe7b   :  { %v1054_v6 = vadd.f32 %v1049_v3, %v968_v2 }
 0xe7c   :  { %v1051_v7 = vpop.f32.mrf.mxu0 }
 0xe7d   :  { %v2008_v8 = vmul.f32 -1.442695, %v1054_v6  ;;  %v1055_v9 = vadd.f32 %v1051_v7, %v970_v5 }
 0xe7f   :  { %2130 = vpow2.f32 %v2008_v8  ;;  %v2009_v10 = vmul.f32 -1.442695, %v1055_v9 }
 0xe81   :  { %2132 = vpow2.f32 %v2009_v10 }
 0xe8c   :  { %v2131_v11 = vpop.eup %2130 }
 0xe8d   :  { %v1059_v12 = vadd.f32 1.0, %v2131_v11 }
 0xe8e   :  { %v2133_v13 = vpop.eup %2132 }
 0xe8f   :  { %v1065_v14 = vadd.f32 1.0, %v2133_v13  ;;  %2134 = vrcp.f32 %v1059_v12 }
 0xe91   :  { %2136 = vrcp.f32 %v1065_v14 }
 0xe9c   :  { %v2135_v15 = vpop.eup %2134 }
 0xe9d   :  { %v1073_v52 = vmul.f32 2.0, %v2135_v15  ;;  %v1072_v48 = vmul.f32 %v2135_v15, %v1070_v47 }
 0xe9e   :  { %v2137_v16 = vpop.eup %2136 }
 0xe9f   :  { %v1090_v17 = vmul.f32 2.0, %v2137_v16  ;;  %v2010_v4 = vadd.f32 -1.0, %v1073_v52  ;;  %v1089_v43 = vmul.f32 %v2137_v16, %v1087_v54  ;;  %v2181_v52 = vld [vmem:[%s3135_s4 + $0x58] sm:$0xff] }
 0xea1   :  { %v2011_v18 = vadd.f32 -1.0, %v1090_v17 }
 0xea3   :  { %1093 = vrot.lane.b32.xlu1 %v2011_v18, %s2310_s30  ;;  %v2179_v18 = vld [vmem:[%s3135_s4 + $0x68] sm:$0xff] }
 0xea7   :  { %1076 = vrot.lane.b32.xlu1 %v2010_v4, %s2310_s30  ;;  %v2182_v4 = vld [vmem:[%s3135_s4 + $0x50] sm:$0xff] }
 0xf15   :  { %v1094_v38 = vpop.permute.xlu1 %1093 }
 0xf16   :  { %v1096_v49 = vmul.f32 %v2137_v16, %v1094_v38  ;;  %v2183_v38 = vld [vmem:[%s3135_s4 + $0x48] sm:$0xff] }
 0xf18   :  { %1098 = vrot.lane.b32.xlu1 %v1096_v49, %s2308_s9  ;;  %v2184_v49 = vld [vmem:[%s3135_s4 + $0x40] sm:$0xff] }
 0xf19   :  { %v1077_v41 = vpop.permute.xlu1 %1076 }
 0xf1a   :  { %v1079_v42 = vmul.f32 %v2135_v15, %v1077_v41  ;;  %v2185_v41 = vld [vmem:[%s3135_s4 + $0x38] sm:$0xff] }
 0xf1c   :  { %1081 = vrot.lane.b32.xlu1 %v1079_v42, %s2308_s9  ;;  %v2186_v42 = vld [vmem:[%s3135_s4 + $0x30] sm:$0xff] }
 0xf8a   :  { %v1099_v45 = vpop.permute.xlu1 %1098 }
 0xf8b   :  { %v1101_v46 = vadd.f32 %v1099_v45, %v1089_v43  ;;  %v2188_v43 = vld [vmem:[%s3135_s4 + $0x20] sm:$0xff]  ;;  %v2189_v45 = vld [vmem:[%s3135_s4 + $0x18] sm:$0xff] }
 0xf8d   :  { %2138 = vtanh.f32 %v1101_v46  ;;  %v1158_v3 = vsub.f32 %v1101_v46, %v1087_v54  ;;  %v2187_v54 = vld [vmem:[%s3135_s4 + $0x28] sm:$0xff]  ;;  %v2190_v46 = vld [vmem:[%s3135_s4 + $0x10] sm:$0xff] }
 0xf8e   :  { %v1082_v50 = vpop.permute.xlu1 %1081 }
 0xf8f   :  { %v1084_v51 = vadd.f32 %v1082_v50, %v1072_v48  ;;  %v1159_v6 = vmul.f32 %v1158_v3, %v2836_v59  ;;  %v2192_v48 = vld [vmem:[%s3135_s4] sm:$0xff]  ;;  %v1172_v50 = vld [vmem:[#allocation3 + $0x28] sm:$0xff] }
 0xf91   :  { %2140 = vtanh.f32 %v1084_v51  ;;  %v1130_v7 = vsub.f32 %v1084_v51, %v1070_v47  ;;  %v2191_v47 = vld [vmem:[%s3135_s4 + $0x8] sm:$0xff] }
 0xf9a   :  { %v2139_v30 = vpop.eup %2138 }
 0xf9b   :  { %1110 = vrot.lane.b32.xlu1 %v2139_v30, %s2310_s30  ;;  %v1174_v30 = vld [vmem:[#allocation6 + $0x10] sm:$0xff] }
 0xf9e   :  { %v2141_v1 = vpop.eup %2140 }
 0xf9f   :  { %1121 = vperm.xlu1 %2080, %v2005_v57   ;;  %1104 = vrot.lane.b32.xlu0 %v2141_v1, %s2310_s30 }
 0xfa3   :  { %1115 = vrot.lane.b32.xlu1 %v2803_v37, %s2311_s12 }
0x100d   :  { %v1111_v36 = vpop.permute.xlu1 %1110 }
0x100e   :  { %v2838_v60 = vmul.f32 %v2137_v16, %v1111_v36 }
0x1010   :  { %v1146_v20 = vsub.f32 %v2838_v60, %v1144_v19 }
0x1011   :  { %v1105_v24 = vpop.permute.xlu0 %1104 }
0x1012   :  { %v1152_v22 = vmul.f32 %v2836_v59, %v1146_v20  ;;  %v1107_v27 = vmul.f32 %v2135_v15, %v1105_v24 }
0x1014   :  { %1154 = vrot.lane.b32.xlu0 %v1152_v22, %s2308_s9 }
0x101a   :  { %v1122_v26 = vpop.permute.xlu1 %1121 }
0x101b   :  { %v2843_v29 = vmul.f32 %v1122_v26, %v1107_v27  ;;  %v1131_v8 = vmul.f32 %v1130_v7, %v1122_v26 }
0x101e   :  { %v1116_v32 = vpop.permute.xlu1 %1115 }
0x101f   :  { %v1118_v2 = vsub.f32 %v1107_v27, %v1116_v32 }
0x1021   :  { %v1124_v5 = vmul.f32 %v1122_v26, %v1118_v2 }
0x1023   :  { %1126 = vrot.lane.b32.xlu1 %v1124_v5, %s2308_s9 }
0x1027   :  { %1161 = vrot.lane.b32.xlu1 %v1159_v6, %s2311_s12 }
0x102b   :  { %1133 = vrot.lane.b32.xlu1 %v1131_v8, %s2311_s12 }
0x1086   :  { %v1155_v9 = vpop.permute.xlu0 %1154 }
0x1087   :  { %v2850_v10 = vadd.f32 %v1155_v9, %v2783_v56  ;;  %v2013_v56 = vld [vmem:[%s3134_s3 + $0x10] sm:$0xff] }
0x1089   :  { %1180 = vrot.lane.b32.xlu0 %v2850_v10, %s2308_s9 }
0x1095   :  { %v1127_v11 = vpop.permute.xlu1 %1126 }
0x1099   :  { %v1162_v12 = vpop.permute.xlu1 %1161 }
0x109a   :  { %v2855_v13 = vadd.f32 %v1162_v12, %v2788_v25  ;;  %v2870_v25 = vadd.f32 %v1127_v11, %v2803_v37  ;;  %v2180_v37 = vld [vmem:[%s3135_s4 + $0x60] sm:$0xff] }
0x109c   :  { %1290 = vrot.lane.b32.xlu1 %v2855_v13, %s2308_s9 }
0x109d   :  { %v1134_v14 = vpop.permute.xlu1 %1133 }
0x109e   :  { %v2860_v15 = vadd.f32 %v1134_v14, %v2793_v28  ;;  %v2178_v28 = vld [vmem:[%s3135_s4 + $0x70] sm:$0xff] }
0x10a0   :  { %1273 = vrot.lane.b32.xlu1 %v2860_v15, %s2308_s9 }
0x10a4   :  { %1353 = vperm.xlu1 %2080, %v2013_v56  }
0x10a8   :  { %1347 = vrot.lane.b32.xlu1 %v2850_v10, %s2311_s12 }
0x10fb   :  { %v1181_v16 = vpop.permute.xlu0 %1180 }
0x10fc   :  { %v1183_v17 = vsel %vm117_vm0, %v2870_v25, %v1181_v16 }
0x10fd   :  { %2014 = vmatmul.mubr.msk.f32.vlgmr.msra.gmra.mxu1 %vm163_vm1, %v1183_v17 }
0x10fe   :  { %1610 = vmatpush1.msra.mxu1 %v2178_v28  ;;  %1657 = vmatprep.mubr.f32.mxu1 %v2307_v0 }
0x10ff   :  { %1611 = vmatprep.subr.mxu1 %v2179_v18 }
0x1100   :  { %1612 = vmatpush1.msra.mxu1 %v2180_v37 }
0x1101   :  { %1613 = vmatprep.subr.mxu1 %v2181_v52 }
0x1102   :  { %1614 = vmatpush1.msra.mxu1 %v2182_v4 }
0x1103   :  { %1615 = vmatprep.subr.mxu1 %v2183_v38  ;;  %v2012_v38 = vld [vmem:[%s3133_s2 + $0x28] sm:$0xff] }
0x1104   :  { %1616 = vmatpush1.msra.mxu1 %v2184_v49 }
0x1105   :  { %1617 = vmatprep.subr.mxu1 %v2185_v41 }
0x1106   :  { %1618 = vmatpush1.msra.mxu1 %v2186_v42 }
0x1107   :  { %1619 = vmatprep.subr.mxu1 %v2187_v54 }
0x1108   :  { %1620 = vmatpush1.msra.mxu1 %v2188_v43 }
0x1109   :  { %1621 = vmatprep.subr.mxu1 %v2189_v45 }
0x110a   :  { %1622 = vmatpush1.msra.mxu1 %v2190_v46 }
0x110b   :  { %1623 = vmatprep.subr.mxu1 %v2191_v47 }
0x110c   :  { %1624 = vmatpush1.msra.mxu1 %v2192_v48 }
0x110d   :  { %2056 = vmatprep.subr.mxu1 %v2307_v0 }
0x110e   :  { %v1291_v14 = vpop.permute.xlu1 %1290 }
0x1112   :  { %v1274_v28 = vpop.permute.xlu1 %1273 }
0x111f   :  { %v2933_v41 = vpop.permute.xlu1 %1353 }
0x1123   :  { %v1348_v43 = vpop.permute.xlu1 %1347 }
0x11bd   :  { %v1253_v51 = vpop.f32.mrf.mxu1 }
0x11be   :  { %v1258_v57 = vadd.f32 %v1253_v51, %v1172_v50 }
0x11bf   :  { %v1255_v1 = vpop.f32.mrf.mxu1 }
0x11c0   :  { %v2015_v36 = vmul.f32 -1.442695, %v1258_v57  ;;  %v1259_v19 = vadd.f32 %v1255_v1, %v1174_v30 }
0x11c2   :  { %2142 = vpow2.f32 %v2015_v36  ;;  %v2016_v20 = vmul.f32 -1.442695, %v1259_v19 }
0x11c4   :  { %2144 = vpow2.f32 %v2016_v20 }
0x11cf   :  { %v2143_v22 = vpop.eup %2142 }
0x11d0   :  { %v1263_v24 = vadd.f32 1.0, %v2143_v22 }
0x11d1   :  { %v2145_v27 = vpop.eup %2144 }
0x11d2   :  { %v1269_v26 = vadd.f32 1.0, %v2145_v27  ;;  %2146 = vrcp.f32 %v1263_v24 }
0x11d4   :  { %2148 = vrcp.f32 %v1269_v26 }
0x11df   :  { %v2147_v32 = vpop.eup %2146 }
0x11e0   :  { %v1277_v6 = vmul.f32 2.0, %v2147_v32  ;;  %v1276_v18 = vmul.f32 %v2147_v32, %v1274_v28 }
0x11e1   :  { %v2149_v2 = vpop.eup %2148 }
0x11e2   :  { %v1294_v3 = vmul.f32 2.0, %v2149_v2  ;;  %v2017_v7 = vadd.f32 -1.0, %v1277_v6  ;;  %v1293_v56 = vmul.f32 %v2149_v2, %v1291_v14 }
0x11e4   :  { %v2018_v5 = vadd.f32 -1.0, %v1294_v3 }
0x11e6   :  { %1297 = vrot.lane.b32.xlu0 %v2018_v5, %s2310_s30 }
0x11ea   :  { %1280 = vrot.lane.b32.xlu0 %v2017_v7, %s2310_s30 }
0x1258   :  { %v1298_v8 = vpop.permute.xlu0 %1297 }
0x1259   :  { %v1300_v9 = vmul.f32 %v2149_v2, %v1298_v8 }
0x125b   :  { %1302 = vrot.lane.b32.xlu0 %v1300_v9, %s2308_s9  ;;  %v1378_v9 = vld [vmem:[#allocation6 + $0x8] sm:$0xff] }
0x125c   :  { %v1281_v11 = vpop.permute.xlu0 %1280 }
0x125d   :  { %v1283_v12 = vmul.f32 %v2147_v32, %v1281_v11 }
0x125f   :  { %1285 = vrot.lane.b32.xlu0 %v1283_v12, %s2308_s9 }
0x12cd   :  { %v1303_v16 = vpop.permute.xlu0 %1302 }
0x12ce   :  { %v1305_v17 = vadd.f32 %v1303_v16, %v1293_v56 }
0x12d0   :  { %2150 = vtanh.f32 %v1305_v17  ;;  %v1362_v1 = vsub.f32 %v1305_v17, %v1291_v14 }
0x12d1   :  { %v1286_v37 = vpop.permute.xlu0 %1285 }
0x12d2   :  { %v1288_v52 = vadd.f32 %v1286_v37, %v1276_v18  ;;  %v1363_v19 = vmul.f32 %v1362_v1, %v2933_v41 }
0x12d4   :  { %2152 = vtanh.f32 %v1288_v52  ;;  %v1334_v20 = vsub.f32 %v1288_v52, %v1274_v28 }
0x12dd   :  { %v2151_v4 = vpop.eup %2150 }
0x12de   :  { %1314 = vrot.lane.b32.xlu0 %v2151_v4, %s2310_s30 }
0x12e1   :  { %v2153_v49 = vpop.eup %2152 }
0x12e2   :  { %1308 = vrot.lane.b32.xlu1 %v2153_v49, %s2310_s30  ;;  %1325 = vperm.xlu0 %2081, %v2012_v38  }
0x12e6   :  { %1319 = vrot.lane.b32.xlu0 %v2870_v25, %s2311_s12 }
0x1350   :  { %v1315_v42 = vpop.permute.xlu0 %1314 }
0x1351   :  { %v2935_v54 = vmul.f32 %v2149_v2, %v1315_v42 }
0x1353   :  { %v1350_v45 = vsub.f32 %v2935_v54, %v1348_v43 }
0x1354   :  { %v1309_v47 = vpop.permute.xlu1 %1308 }
0x1355   :  { %v1356_v46 = vmul.f32 %v2933_v41, %v1350_v45  ;;  %v1311_v48 = vmul.f32 %v2147_v32, %v1309_v47 }
0x1357   :  { %1358 = vrot.lane.b32.xlu1 %v1356_v46, %s2308_s9 }
0x135d   :  { %v1326_v50 = vpop.permute.xlu0 %1325 }
0x135e   :  { %v2940_v51 = vmul.f32 %v1326_v50, %v1311_v48  ;;  %v1335_v22 = vmul.f32 %v1334_v20, %v1326_v50 }
0x1361   :  { %v1320_v30 = vpop.permute.xlu0 %1319 }
0x1362   :  { %v1322_v57 = vsub.f32 %v1311_v48, %v1320_v30 }
0x1364   :  { %v1328_v36 = vmul.f32 %v1326_v50, %v1322_v57 }
0x1366   :  { %1330 = vrot.lane.b32.xlu0 %v1328_v36, %s2308_s9 }
0x136a   :  { %1365 = vrot.lane.b32.xlu0 %v1363_v19, %s2311_s12 }
0x136e   :  { %1337 = vrot.lane.b32.xlu0 %v1335_v22, %s2311_s12 }
0x13c9   :  { %v1359_v24 = vpop.permute.xlu1 %1358 }
0x13ca   :  { %v2947_v27 = vadd.f32 %v1359_v24, %v2850_v10  ;;  %v2020_v10 = vld [vmem:[%s3134_s3 + $0x8] sm:$0xff]  ;;  %v2019_v24 = vld [vmem:[%s3133_s2 + $0x30] sm:$0xff] }
0x13cc   :  { %1384 = vrot.lane.b32.xlu1 %v2947_v27, %s2308_s9 }
0x13d8   :  { %v1331_v26 = vpop.permute.xlu0 %1330 }
0x13dc   :  { %v1366_v32 = vpop.permute.xlu0 %1365 }
0x13dd   :  { %v2952_v2 = vadd.f32 %v1366_v32, %v2855_v13  ;;  %v2967_v13 = vadd.f32 %v1331_v26, %v2870_v25 }
0x13df   :  { %1494 = vrot.lane.b32.xlu0 %v2952_v2, %s2308_s9 }
0x13e0   :  { %v1338_v3 = vpop.permute.xlu0 %1337 }
0x13e1   :  { %v2957_v5 = vadd.f32 %v1338_v3, %v2860_v15  ;;  %v1376_v15 = vld [vmem:[#allocation3 + $0x30] sm:$0xff] }
0x13e3   :  { %1477 = vrot.lane.b32.xlu0 %v2957_v5, %s2308_s9 }
0x13e7   :  { %1557 = vperm.xlu0 %2081, %v2020_v10  }
0x13eb   :  { %1551 = vrot.lane.b32.xlu0 %v2947_v27, %s2311_s12 }
0x143e   :  { %v1385_v6 = vpop.permute.xlu1 %1384 }
0x143f   :  { %v1387_v7 = vsel %vm117_vm0, %v2967_v13, %v1385_v6 }
0x1440   :  { %2021 = vmatmul.mubr.msk.f32.vlgmr.msra.gmra.mxu0 %vm163_vm1, %v1387_v7 }
0x1441   :  { %2053 = vmatprep.mubr.msk.f32.mxu0 %vm2312_vm2, %v2307_v0 }
0x1451   :  { %v1495_v48 = vpop.permute.xlu0 %1494 }
0x1455   :  { %v1478_v1 = vpop.permute.xlu0 %1477 }
0x1462   :  { %v2983_v32 = vpop.permute.xlu0 %1557 }
0x1466   :  { %v1552_v6 = vpop.permute.xlu0 %1551 }
0x1500   :  { %v1457_v8 = vpop.f32.mrf.mxu0 }
0x1501   :  { %v1462_v11 = vadd.f32 %v1457_v8, %v1376_v15 }
0x1502   :  { %v1459_v12 = vpop.f32.mrf.mxu0 }
0x1503   :  { %v2022_v14 = vmul.f32 -1.442695, %v1462_v11  ;;  %v1463_v56 = vadd.f32 %v1459_v12, %v1378_v9 }
0x1505   :  { %2154 = vpow2.f32 %v2022_v14  ;;  %v2023_v16 = vmul.f32 -1.442695, %v1463_v56 }
0x1507   :  { %2156 = vpow2.f32 %v2023_v16 }
0x1512   :  { %v2155_v17 = vpop.eup %2154 }
0x1513   :  { %v1467_v28 = vadd.f32 1.0, %v2155_v17 }
0x1514   :  { %v2157_v25 = vpop.eup %2156 }
0x1515   :  { %v1473_v18 = vadd.f32 1.0, %v2157_v25  ;;  %2158 = vrcp.f32 %v1467_v28 }
0x1517   :  { %2160 = vrcp.f32 %v1473_v18 }
0x1522   :  { %v2159_v37 = vpop.eup %2158 }
0x1523   :  { %v1481_v49 = vmul.f32 2.0, %v2159_v37  ;;  %v1480_v36 = vmul.f32 %v2159_v37, %v1478_v1 }
0x1524   :  { %v2161_v52 = vpop.eup %2160 }
0x1525   :  { %v1498_v4 = vmul.f32 2.0, %v2161_v52  ;;  %v2024_v42 = vadd.f32 -1.0, %v1481_v49  ;;  %v1497_v50 = vmul.f32 %v2161_v52, %v1495_v48 }
0x1527   :  { %v2025_v38 = vadd.f32 -1.0, %v1498_v4 }
0x1529   :  { %1501 = vrot.lane.b32.xlu1 %v2025_v38, %s2310_s30 }
0x152d   :  { %1484 = vrot.lane.b32.xlu1 %v2024_v42, %s2310_s30 }
0x159b   :  { %v1502_v43 = vpop.permute.xlu1 %1501 }
0x159c   :  { %v1504_v45 = vmul.f32 %v2161_v52, %v1502_v43  ;;  %v1580_v43 = vld [vmem:[#allocation3 + $0x38] sm:$0xff] }
0x159e   :  { %1506 = vrot.lane.b32.xlu1 %v1504_v45, %s2308_s9  ;;  %v1581_v45 = vld [vmem:[#allocation6] sm:$0xff] }
0x159f   :  { %v1485_v46 = vpop.permute.xlu1 %1484 }
0x15a0   :  { %v1487_v47 = vmul.f32 %v2159_v37, %v1485_v46 }
0x15a2   :  { %1489 = vrot.lane.b32.xlu1 %v1487_v47, %s2308_s9 }
0x1610   :  { %v1507_v30 = vpop.permute.xlu1 %1506 }
0x1611   :  { %v1509_v57 = vadd.f32 %v1507_v30, %v1497_v50 }
0x1613   :  { %2162 = vtanh.f32 %v1509_v57  ;;  %v1566_v18 = vsub.f32 %v1509_v57, %v1495_v48 }
0x1614   :  { %v1490_v19 = vpop.permute.xlu1 %1489 }
0x1615   :  { %v1492_v20 = vadd.f32 %v1490_v19, %v1480_v36 }
0x1617   :  { %2164 = vtanh.f32 %v1492_v20  ;;  %v1538_v17 = vsub.f32 %v1492_v20, %v1478_v1 }
0x1620   :  { %v2163_v22 = vpop.eup %2162 }
0x1621   :  { %1518 = vrot.lane.b32.xlu1 %v2163_v22, %s2310_s30 }
0x1624   :  { %v2165_v26 = vpop.eup %2164 }
0x1625   :  { %1529 = vperm.xlu1 %2080, %v2019_v24   ;;  %1512 = vrot.lane.b32.xlu0 %v2165_v26, %s2310_s30 }
0x1629   :  { %1523 = vrot.lane.b32.xlu1 %v2967_v13, %s2311_s12 }
0x1693   :  { %v1519_v3 = vpop.permute.xlu1 %1518 }
0x1694   :  { %v2985_v10 = vmul.f32 %v2161_v52, %v1519_v3 }
0x1696   :  { %v1554_v7 = vsub.f32 %v2985_v10, %v1552_v6 }
0x1697   :  { %v1513_v8 = vpop.permute.xlu0 %1512 }
0x1698   :  { %v1560_v15 = vmul.f32 %v2983_v32, %v1554_v7  ;;  %v1515_v9 = vmul.f32 %v2159_v37, %v1513_v8  ;;  %v1567_v37 = vmul.f32 %v1566_v18, %v2983_v32 }
0x169a   :  { %1562 = vrot.lane.b32.xlu0 %v1560_v15, %s2308_s9 }
0x16a0   :  { %v1530_v11 = vpop.permute.xlu1 %1529 }
0x16a1   :  { %v2990_v12 = vmul.f32 %v1530_v11, %v1515_v9  ;;  %v1539_v28 = vmul.f32 %v1538_v17, %v1530_v11 }
0x16a4   :  { %v1524_v14 = vpop.permute.xlu1 %1523 }
0x16a5   :  { %v1526_v56 = vsub.f32 %v1515_v9, %v1524_v14 }
0x16a7   :  { %v1532_v16 = vmul.f32 %v1530_v11, %v1526_v56 }
0x16a9   :  { %1534 = vrot.lane.b32.xlu1 %v1532_v16, %s2308_s9 }
0x16ad   :  { %1541 = vrot.lane.b32.xlu1 %v1539_v28, %s2311_s12 }
0x170c   :  { %v1563_v25 = vpop.permute.xlu0 %1562 }
0x170d   :  { %v2995_v52 = vadd.f32 %v1563_v25, %v2947_v27 }
0x170f   :  { %1586 = vrot.lane.b32.xlu0 %v2995_v52, %s2308_s9 }
0x1713   :  { %1569 = vrot.lane.b32.xlu0 %v1567_v37, %s2311_s12 }
0x171b   :  { %v1535_v4 = vpop.permute.xlu1 %1534 }
0x171c   :  { %v3002_v38 = vadd.f32 %v1535_v4, %v2967_v13 }
0x171f   :  { %v1542_v3 = vpop.permute.xlu1 %1541 }
0x1720   :  { %v3015_v15 = vadd.f32 %v1542_v3, %v2957_v5  ;;  %v2026_v5 = vld [vmem:[%s3133_s2 + $0x38] sm:$0xff] }
0x1781   :  { %v1587_v49 = vpop.permute.xlu0 %1586 }
0x1782   :  { %v1589_v42 = vsel %vm117_vm0, %v3002_v38, %v1587_v49 }
0x1783   :  { %2027 = vmatmul.mubr.msk.f32.vlgmr.msra.gmra.mxu1 %vm163_vm1, %v1589_v42 }
0x1784   :  { %2064 = vmatprep.mubr.msk.f32.mxu1 %vm2312_vm2, %v2307_v0 }
0x1785   :  { %v1570_v7 = vpop.permute.xlu0 %1569 }
0x1786   :  { %v3019_v8 = vadd.f32 %v1570_v7, %v2952_v2  ;;  %v1584_v2 = vld [vmem:[%s3134_s3] sm:$0xff] }
0x1843   :  { %v1659_v27 = vpop.f32.mrf.mxu1 }
0x1844   :  { %v1664_v46 = vadd.f32 %v1659_v27, %v1580_v43  ;;  %v321_v27 = vmul.f32 %v2565_v23, %v2562_v21  ;;  %v729_v21 = vmul.f32 %v2704_v62, %v2706_v63  ;;  %v1793_v23 = vld [vmem:[#allocation8 + $0x18] sm:$0xff]  ;;  %v1573_v62 = vmul.f32 %v2983_v32, %v2985_v10  ;;  %v1795_v63 = vld [vmem:[#allocation9 + $0x8] sm:$0xff] }
0x1845   :  { %v1661_v47 = vpop.f32.mrf.mxu1  ;;  %2057 = vmatpush3.msra.mxu1 %v1793_v23 }
0x1846   :  { %v2028_v48 = vmul.f32 -1.442695, %v1664_v46  ;;  %v1665_v50 = vadd.f32 %v1661_v47, %v1581_v45  ;;  %v349_v45 = vmul.f32 %v2555_v58, %v2557_v61  ;;  %v525_v46 = vmul.f32 %v2632_v39, %v2634_v40  ;;  %2058 = vmatprep.subr.mxu1 %v2307_v0  ;;  %v1796_v39 = vld [vmem:[#allocation9 + $0x10] sm:$0xff] }
0x1847   :  { %v553_v47 = vmul.f32 %v2625_v31, %v2627_v34  ;;  %v757_v58 = vmul.f32 %v2697_v55, %v2699_v35  ;;  %v961_v61 = vmul.f32 %v2769_v33, %v2771_v44  ;;  %v1797_v31 = vld [vmem:[#allocation9 + $0x18] sm:$0xff]  ;;  %v1792_v34 = vld [vmem:[#allocation8 + $0x10] sm:$0xff]  ;;  %v1165_v40 = vmul.f32 %v2836_v59, %v2838_v60  ;;  %v1791_v55 = vld [vmem:[#allocation8 + $0x8] sm:$0xff] }
0x1848   :  { %2166 = vpow2.f32 %v2028_v48  ;;  %v2029_v30 = vmul.f32 -1.442695, %v1665_v50  ;;  %2046 = vmatpush3.msra.mxu0 %v1797_v31  ;;  %2059 = vmatpush3.msra.mxu1 %v1792_v34  ;;  %v1369_v35 = vmul.f32 %v2933_v41, %v2935_v54  ;;  %v1790_v33 = vld [vmem:[#allocation8] sm:$0xff] }
0x1849   :  { %2047 = vmatprep.subr.mxu0 %v2307_v0  ;;  %2060 = vmatprep.subr.mxu1 %v2307_v0  ;;  %v1794_v44 = vld [vmem:[#allocation9] sm:$0xff] }
0x184a   :  { %2168 = vpow2.f32 %v2029_v30  ;;  %2048 = vmatpush3.msra.mxu0 %v1796_v39  ;;  %2061 = vmatpush3.msra.mxu1 %v1791_v55 }
0x184b   :  { %2049 = vmatprep.subr.mxu0 %v2307_v0  ;;  %2062 = vmatprep.subr.mxu1 %v2307_v0 }
0x184c   :  { %2050 = vmatpush3.msra.mxu0 %v1795_v63  ;;  %2063 = vmatpush3.msra.mxu1 %v1790_v33 }
0x184d   :  { %2051 = vmatprep.subr.mxu0 %v2307_v0 }
0x184e   :  { %2052 = vmatpush3.msra.mxu0 %v1794_v44 }
0x1855   :  { %v2167_v57 = vpop.eup %2166 }
0x1856   :  { %v1669_v1 = vadd.f32 1.0, %v2167_v57 }
0x1857   :  { %v2169_v13 = vpop.eup %2168 }
0x1858   :  { %2170 = vrcp.f32 %v1669_v1  ;;  %v1675_v36 = vadd.f32 1.0, %v2169_v13 }
0x185a   :  { %2172 = vrcp.f32 %v1675_v36 }
0x1865   :  { %v3007_v19 = vpop.eup %2170 }
0x1866   :  { %v1683_v20 = vmul.f32 2.0, %v3007_v19 }
0x1867   :  { %v3010_v22 = vpop.eup %2172 }
0x1868   :  { %v2030_v24 = vadd.f32 -1.0, %v1683_v20  ;;  %v1700_v26 = vmul.f32 2.0, %v3010_v22 }
0x186a   :  { %1686 = vrot.lane.b32.xlu1 %v2030_v24, %s2310_s30  ;;  %v2031_v6 = vadd.f32 -1.0, %v1700_v26  ;;  %v150_v26 = vld [vmem:[#allocation2 + $0x28] sm:$0xff] }
0x186c   :  { %1703 = vrot.lane.b32.xlu0 %v2031_v6, %s2310_s30 }
0x186e   :  { %1679 = vrot.lane.b32.xlu1 %v3015_v15, %s2308_s9 }
0x1870   :  { %1696 = vrot.lane.b32.xlu0 %v3019_v8, %s2308_s9 }
0x18dc   :  { %v1687_v9 = vpop.permute.xlu1 %1686 }
0x18dd   :  { %v1689_v11 = vmul.f32 %v3007_v19, %v1687_v9 }
0x18de   :  { %v1704_v14 = vpop.permute.xlu0 %1703 }
0x18df   :  { %v1706_v56 = vmul.f32 %v3010_v22, %v1704_v14  ;;  %1691 = vrot.lane.b32.xlu1 %v1689_v11, %s2308_s9 }
0x18e0   :  { %v3035_v16 = vpop.permute.xlu1 %1679 }
0x18e1   :  { %1708 = vrot.lane.b32.xlu0 %v1706_v56, %s2308_s9  ;;  %v1682_v28 = vmul.f32 %v3007_v19, %v3035_v16 }
0x18e2   :  { %v3037_v17 = vpop.permute.xlu0 %1696 }
0x18e3   :  { %1731 = vperm.xlu1 %2080, %v2026_v5   ;;  %v1699_v18 = vmul.f32 %v3010_v22, %v3037_v17 }
0x18e5   :  { %1759 = vperm.xlu0 %2081, %v1584_v2  }
0x1951   :  { %v1692_v25 = vpop.permute.xlu1 %1691 }
0x1952   :  { %v3043_v37 = vadd.f32 %v1692_v25, %v1682_v28 }
0x1953   :  { %v1709_v4 = vpop.permute.xlu0 %1708 }
0x1954   :  { %2174 = vtanh.f32 %v3043_v37  ;;  %v3046_v49 = vadd.f32 %v1709_v4, %v1699_v18  ;;  %v1740_v0 = vsub.f32 %v3043_v37, %v3035_v16 }
0x1956   :  { %2176 = vtanh.f32 %v3046_v49 }
0x1960   :  { %v1760_v59 = vpop.permute.xlu0 %1759 }
0x1961   :  { %v2175_v42 = vpop.eup %2174 }
0x1962   :  { %1714 = vrot.lane.b32.xlu1 %v2175_v42, %s2310_s30 }
0x1963   :  { %v2177_v43 = vpop.eup %2176 }
0x1964   :  { %1720 = vrot.lane.b32.xlu0 %v2177_v43, %s2310_s30 }
0x1966   :  { %323 = vrot.lane.b32.xlu1 %v321_v27, %s2308_s9 }
0x1968   :  { %351 = vrot.lane.b32.xlu0 %v349_v45, %s2308_s9 }
0x196a   :  { %527 = vrot.lane.b32.xlu1 %v525_v46, %s2308_s9 }
0x196c   :  { %555 = vrot.lane.b32.xlu0 %v553_v47, %s2308_s9 }
0x196e   :  { %731 = vrot.lane.b32.xlu1 %v729_v21, %s2308_s9 }
0x1970   :  { %759 = vrot.lane.b32.xlu0 %v757_v58, %s2308_s9 }
0x1972   :  { %935 = vrot.lane.b32.xlu1 %v2776_v53, %s2308_s9  ;;  %v1732_v53 = vpop.permute.xlu1 %1731 }
0x1973   :  { %v1741_v10 = vmul.f32 %v1740_v0, %v1732_v53 }
0x1974   :  { %963 = vrot.lane.b32.xlu0 %v961_v61, %s2308_s9 }
0x1976   :  { %1139 = vrot.lane.b32.xlu1 %v2843_v29, %s2308_s9 }
0x1978   :  { %1167 = vrot.lane.b32.xlu0 %v1165_v40, %s2308_s9 }
0x197a   :  { %1343 = vrot.lane.b32.xlu1 %v2940_v51, %s2308_s9 }
0x197c   :  { %1371 = vrot.lane.b32.xlu0 %v1369_v35, %s2308_s9 }
0x197e   :  { %1547 = vrot.lane.b32.xlu1 %v2990_v12, %s2308_s9  ;;  %v1768_v12 = vsub.f32 %v3046_v49, %v3037_v17 }
0x1980   :  { %1575 = vrot.lane.b32.xlu0 %v1573_v62, %s2308_s9  ;;  %v1769_v48 = vmul.f32 %v1768_v12, %v1760_v59 }
0x19d4   :  { %v1715_v60 = vpop.permute.xlu1 %1714 }
0x19d5   :  { %v1717_v29 = vmul.f32 %v3007_v19, %v1715_v60 }
0x19d6   :  { %v1721_v41 = vpop.permute.xlu0 %1720 }
0x19d7   :  { %v1747_v54 = vmul.f32 %v1732_v53, %v1717_v29  ;;  %v1723_v51 = vmul.f32 %v3010_v22, %v1721_v41  ;;  %v144_v22 = vld [vmem:[#allocation2 + $0x10] sm:$0xff] }
0x19d8   :  { %v324_v50 = vpop.permute.xlu1 %323 }
0x19d9   :  { %v1775_v32 = vmul.f32 %v1760_v59, %v1723_v51  ;;  %1749 = vrot.lane.b32.xlu1 %v1747_v54, %s2308_s9  ;;  %v326_v6 = vadd.f32 %v324_v50, %v144_v22 }
0x19da   :  { %v352_v30 = vpop.permute.xlu0 %351 }
0x19db   :  { %1777 = vrot.lane.b32.xlu0 %v1775_v32, %s2308_s9  ;;  %v354_v7 = vadd.f32 %v352_v30, %v150_v26 }
0x19dc   :  { %v528_v57 = vpop.permute.xlu1 %527 }
0x19dd   :  { %1725 = vrot.lane.b32.xlu1 %v3002_v38, %s2311_s12  ;;  %v530_v9 = vadd.f32 %v528_v57, %v326_v6 }
0x19de   :  { %v556_v1 = vpop.permute.xlu0 %555 }
0x19df   :  { %1753 = vrot.lane.b32.xlu0 %v2995_v52, %s2311_s12  ;;  %v558_v14 = vadd.f32 %v556_v1, %v354_v7 }
0x19e0   :  { %v732_v13 = vpop.permute.xlu1 %731 }
0x19e1   :  { %v734_v56 = vadd.f32 %v732_v13, %v530_v9 }
0x19e2   :  { %v760_v36 = vpop.permute.xlu0 %759 }
0x19e3   :  { %1743 = vrot.lane.b32.xlu0 %v1741_v10, %s2311_s12  ;;  %v762_v2 = vadd.f32 %v760_v36, %v558_v14 }
0x19e4   :  { %v936_v19 = vpop.permute.xlu1 %935 }
0x19e5   :  { %v938_v16 = vadd.f32 %v936_v19, %v734_v56 }
0x19e6   :  { %v964_v20 = vpop.permute.xlu0 %963 }
0x19e7   :  { %1771 = vrot.lane.b32.xlu0 %v1769_v48, %s2311_s12  ;;  %v966_v17 = vadd.f32 %v964_v20, %v762_v2 }
0x19e8   :  { %v1140_v24 = vpop.permute.xlu1 %1139 }
0x19e9   :  { %v1142_v28 = vadd.f32 %v1140_v24, %v938_v16 }
0x19ea   :  { %v1168_v3 = vpop.permute.xlu0 %1167 }
0x19eb   :  { %v1170_v18 = vadd.f32 %v1168_v3, %v966_v17 }
0x19ec   :  { %v1344_v11 = vpop.permute.xlu1 %1343 }
0x19ed   :  { %v1346_v37 = vadd.f32 %v1344_v11, %v1142_v28 }
0x19ee   :  { %v1372_v5 = vpop.permute.xlu0 %1371 }
0x19ef   :  { %v1374_v49 = vadd.f32 %v1372_v5, %v1170_v18 }
0x19f0   :  { %v1548_v25 = vpop.permute.xlu1 %1547 }
0x19f1   :  { %v1550_v42 = vadd.f32 %v1548_v25, %v1346_v37 }
0x19f2   :  { %v1576_v4 = vpop.permute.xlu0 %1575 }
0x19f3   :  { %v1578_v27 = vadd.f32 %v1576_v4, %v1374_v49 }
0x1a4b   :  { %v1750_v43 = vpop.permute.xlu1 %1749 }
0x1a4c   :  { %v1752_v45 = vadd.f32 %v1750_v43, %v1550_v42 }
0x1a4d   :  { %v1778_v46 = vpop.permute.xlu0 %1777 }
0x1a4e   :  { %1783 = vst.msk [vmem:[#allocation2 + $0x10] sm:$0xff] %vm117_vm0, %v1752_v45  ;;  %v1780_v47 = vadd.f32 %v1778_v46, %v1578_v27  ;;  %2065 = vmatmul.mubr.msk.f32.vlgmr.msra.gmra.mxu1 %vm117_vm0, %v1752_v45 }
0x1a4f   :  { %v1726_v21 = vpop.permute.xlu1 %1725 }
0x1a50   :  { %1786 = vst.msk [vmem:[#allocation2 + $0x28] sm:$0xff] %vm117_vm0, %v1780_v47  ;;  %v1728_v58 = vsub.f32 %v1717_v29, %v1726_v21  ;;  %2054 = vmatmul.mubr.msk.f32.vlgmr.msra.gmra.mxu0 %vm117_vm0, %v1780_v47 }
0x1a51   :  { %v1754_v61 = vpop.permute.xlu0 %1753 }
0x1a52   :  { %v1734_v23 = vmul.f32 %v1732_v53, %v1728_v58  ;;  %v1756_v31 = vsub.f32 %v1723_v51, %v1754_v61 }
0x1a54   :  { %1736 = vrot.lane.b32.xlu1 %v1734_v23, %s2308_s9  ;;  %v1762_v39 = vmul.f32 %v1760_v59, %v1756_v31  ;;  %v2034_v59 = vld [vmem:[%s3138_s7] ss:$0 sm:$0xff] }
0x1a55   :  { %v1744_v34 = vpop.permute.xlu0 %1743 }
0x1a56   :  { %v1746_v40 = vadd.f32 %v1744_v34, %v3015_v15 }
0x1a58   :  { %1782 = vst.msk [vmem:[#allocation2 + $0x8] sm:$0xff] %vm117_vm0, %v1746_v40  ;;  %1764 = vrot.lane.b32.xlu1 %v1762_v39, %s2308_s9  ;;  %s2313_s9 = smov [#allocation11]  }
0x1a59   :  { %v1772_v55 = vpop.permute.xlu0 %1771  ;;  %s1959_s30 = sshll.u32 %s2313_s9, 4  ;;  %s1960_s30 = int_to_ptr.vmem [resolvable:$true] %s1959_s30 }
0x1a5a   :  { %v1774_v35 = vadd.f32 %v1772_v55, %v3019_v8  ;;  %s2273_s12 = scalar_lea.vmem %s1960_s30, 128  ;;  %p2278_p7 = scmp.lt.s32.totalorder %s1960_s30, %s1960_s30 }
0x1a5b   :  { %p2274_p6 = scmp.ne.s32.totalorder %s1960_s30, %s2273_s12  ;;  %p2279_p8 = scmp.lt.s32.totalorder %s2273_s12, %s2273_s12 }
0x1a5c   :  { %1785 = vst.msk [vmem:[#allocation2 + $0x20] sm:$0xff] %vm117_vm0, %v1774_v35 }
0x1a5d   :  { %p2280_p9 = por %p2279_p8, %p2278_p7 }
0x1a5f   :  { %p2281_p10 = pnand %p2280_p9, %p2274_p6 }
0x1ac6   :  { %v1737_v62 = vpop.permute.xlu1 %1736 }
0x1ac7   :  { %v1739_v63 = vadd.f32 %v1737_v62, %v3002_v38 }
0x1ac9   :  { %1781 = vst.msk [vmem:[#allocation2] sm:$0xff] %vm117_vm0, %v1739_v63 }
0x1aca   :  { %v1765_v33 = vpop.permute.xlu1 %1764 }
0x1acb   :  { %v1767_v44 = vadd.f32 %v1765_v33, %v2995_v52 }
0x1acd   :  { %1784 = vst.msk [vmem:[#allocation2 + $0x18] sm:$0xff] %vm117_vm0, %v1767_v44 }
0x1b0e   :  { %v1940_v15 = vpop.f32.mrf.mxu1 }
0x1b10   :  { %v1867_v53 = vpop.f32.mrf.mxu0  ;;  %v2066_v60 = vpop.f32.mrf.mxu1 }
0x1b11   :  { %v1941_v8 = vadd.f32 %v1940_v15, %v1867_v53 }
0x1b12   :  { %v2055_v29 = vpop.f32.mrf.mxu0 }
0x1b13   :  { %v1951_v41 = vadd.f32 %v2034_v59, %v1941_v8 }
0x1b15   :  { %1952 = vst [vmem:[#allocation11] sm:$0xff] %v1951_v41 }
0x1b16   :  { %2284 = shalt.err (!%p2281_p10)
}
0x1b17   :  { %1962 = dma.vmem_to_hbm [thread:$0]  %s1960_s30, 128, %s3139_s8, [#allocation5]  }
0x1b18   :  { %2299 = dma.done.wait [#allocation5], 128  }
0x1b19   :  { %2300 = vsyncadd [#allocation5], 4294967168 }
0x1b1a   :  { %1966 = vsyncpa [#allocation4], 1 }
0x1b1b   :  { %1967 = vsyncpa [#allocation7], 1 }
0x1b1c   :  { %1968 = vsyncpa [#allocation10], 1 }
0x1b1d   :  { %1969 = vsyncpa [#allocation5], 1 }

</bundles_post_ra>
